<compile_context>
chip_gen: v7x
topology: tpu7x:2x2x1
jax: 0.10.0
libtpu: 0.0.40
codegen_flags: <defaults>
</compile_context>

<pallas_src>
import functools

import jax
import jax.numpy as jnp
import numpy as np
from jax.experimental import pallas as pl
from jax.experimental.pallas import tpu as pltpu


def _bilinear_warp_kernel(img_ref, grid_ref, out_ref, acc_ref, *, H, W, tk,
                          compute_dtype):
    """Tiled bilinear grid-sample expressed as (C, tk) x (tk, tn) matmuls.

    img_ref  : (1, C, tk)   k-th tile of the image flattened over HW
    grid_ref : (1, 2, tn)   j-th tile of the sampling grid, ch0 = y, ch1 = x
    out_ref  : (1, C, tn)   output tile (written once, at the last k step)
    acc_ref  : (C, tn) f32  scratch accumulator, resident across the k axis
    """
    k = pl.program_id(2)

    @pl.when(k == 0)
    def _():
        acc_ref[...] = jnp.zeros_like(acc_ref)

    g = grid_ref[0].astype(jnp.float32)        # (2, tn)
    gy = g[0:1, :]                             # normalized H coordinate
    gx = g[1:2, :]                             # normalized W coordinate
    tn = g.shape[1]

    # align_corners=True un-normalization + padding_mode='border' clamp.
    ix = jnp.clip((gx + 1.0) * 0.5 * (W - 1), 0.0, float(W - 1))
    iy = jnp.clip((gy + 1.0) * 0.5 * (H - 1), 0.0, float(H - 1))

    x0f = jnp.floor(ix)
    y0f = jnp.floor(iy)
    wx = ix - x0f                              # (1, tn)
    wy = iy - y0f
    x0 = x0f.astype(jnp.int32)                 # already in [0, W-1]
    y0 = y0f.astype(jnp.int32)
    base = y0 * W + x0                         # (1, tn) flat top-left source index

    w00 = (1.0 - wy) * (1.0 - wx)
    w01 = (1.0 - wy) * wx
    w10 = wy * (1.0 - wx)
    w11 = wy * wx

    # Build only this (tk, tn) slice of the one-hot weight matrix.  A single
    # iota/subtract feeds all four corner comparisons (fused select chain).
    # Border-clamped corners have weight exactly 0, so hits that fall on the
    # "wrong" flat index (base+1 past a row end, base+W past the last row)
    # contribute nothing.
    row = jax.lax.broadcasted_iota(jnp.int32, (tk, tn), 0) + k * tk
    d = row - base                             # (tk, tn)
    s = jnp.where(d == 0, w00,
        jnp.where(d == 1, w01,
        jnp.where(d == W, w10,
        jnp.where(d == W + 1, w11, 0.0))))     # (tk, tn) f32

    img = img_ref[0]                           # (C, tk)
    acc_ref[...] += jnp.dot(img.astype(compute_dtype), s.astype(compute_dtype),
                            preferred_element_type=jnp.float32)

    @pl.when(k == pl.num_programs(2) - 1)
    def _():
        out_ref[0] = acc_ref[...].astype(out_ref.dtype)


def _round_up(x, m):
    return (x + m - 1) // m * m


def _choose_tile(total, preferred, granule=128):
    """Pick a tile (multiple of `granule`, <= preferred) and the padded total."""
    tile = min(preferred, _round_up(total, granule))
    return tile, _round_up(total, tile)


def _forward_stn(input1, input2, *, tk_pref=512, tn_pref=1024, compute_dtype=None):
    B, C, H, W = input1.shape
    Bg, two, Hg, Wg = input2.shape
    assert B == Bg and two == 2

    # fp32 keeps the interpolation weights exact; jnp.bfloat16 halves footprint
    # and doubles MXU throughput on v6e/v7x at ~1e-3 relative error.
    if compute_dtype is None:
        compute_dtype = jnp.float32

    # Channel swap done by the PyTorch module:
    #   input2_ordered[:,0] = input2[:,1] (grid x) ; input2_ordered[:,1] = input2[:,0] (grid y)
    # After permute, grid_sample's x = input2[:,1] and y = input2[:,0], i.e. the
    # kernel's expected (y, x) order is exactly input2's native channel order.
    HW, P = H * W, Hg * Wg
    tk, HW_pad = _choose_tile(HW, tk_pref)
    tn, P_pad = _choose_tile(P, tn_pref)

    img_f = input1.reshape(B, C, HW)
    if HW_pad != HW:
        # Zero padding is safe: padded source rows are only reachable through
        # zero-weight (border-clamped) corners.
        img_f = jnp.pad(img_f, ((0, 0), (0, 0), (0, HW_pad - HW)))
    grid_f = input2.reshape(B, 2, P)
    if P_pad != P:
        # Padded grid columns sample the image center with finite weights and
        # are sliced off below.
        grid_f = jnp.pad(grid_f, ((0, 0), (0, 0), (0, P_pad - P)))

    kernel = functools.partial(_bilinear_warp_kernel, H=H, W=W, tk=tk,
                               compute_dtype=compute_dtype)
    out = pl.pallas_call(
        kernel,
        out_shape=jax.ShapeDtypeStruct((B, C, P_pad), input1.dtype),
        grid_spec=pltpu.PrefetchScalarGridSpec(
            num_scalar_prefetch=0,
            grid=(B, P_pad // tn, HW_pad // tk),
            in_specs=[
                pl.BlockSpec((1, C, tk), lambda b, j, k: (b, 0, k)),
                pl.BlockSpec((1, 2, tn), lambda b, j, k: (b, 0, j)),
            ],
            out_specs=pl.BlockSpec((1, C, tn), lambda b, j, k: (b, 0, j)),
            scratch_shapes=[pltpu.VMEM((C, tn), jnp.float32)],
        ),
        compiler_params=pltpu.CompilerParams(
            dimension_semantics=("parallel", "parallel", "arbitrary"),
            vmem_limit_bytes=32 * 1024 * 1024,
        ),
    )(img_f, grid_f)
    return out[:, :, :P].reshape(B, C, Hg, Wg)


def bilinear_forward(input1, input2, *, using_scale=False, compute_dtype=None):
    """JAX/Pallas equivalent of Bilinear.forward (zero_boundary=False, bilinear)."""
    if using_scale:
        out = _forward_stn((input1 + 1.0) / 2.0, input2, compute_dtype=compute_dtype)
        return 2.0 * out - 1.0
    return _forward_stn(input1, input2, compute_dtype=compute_dtype)


def _reference_grid_sample(img, grid):
    """Pure-JAX reference (border padding, bilinear, align_corners=True)."""
    B, C, H, W = img.shape
    gy = grid[:, 0]                       # (B, Hg, Wg)
    gx = grid[:, 1]
    iy = jnp.clip((gy + 1.0) * 0.5 * (H - 1), 0.0, H - 1.0)
    ix = jnp.clip((gx + 1.0) * 0.5 * (W - 1), 0.0, W - 1.0)

    def per_image(im2d, yy, xx):
        return jax.scipy.ndimage.map_coordinates(im2d, [yy, xx], order=1, mode="nearest")

    def per_batch(im3d, yy, xx):
        return jax.vmap(lambda im2d: per_image(im2d, yy, xx))(im3d)

    return jax.vmap(per_batch)(img, iy, ix)


if __name__ == "__main__":
    key = jax.random.PRNGKey(0)
    k_img, k_grid = jax.random.split(key)

    B, C, H, W = 2, 4, 16, 16
    input1 = jax.random.normal(k_img, (B, C, H, W), dtype=jnp.float32)
    # sampling grid in [-1, 1], channel 0 = H-coordinate, channel 1 = W-coordinate
    input2 = jax.random.uniform(k_grid, (B, 2, H, W), dtype=jnp.float32,
                                minval=-1.0, maxval=1.0)

    out = bilinear_forward(input1, input2)
    out = jax.block_until_ready(out)

    ref = jax.block_until_ready(_reference_grid_sample(input1, input2))
    np.testing.assert_allclose(np.asarray(out), np.asarray(ref), rtol=1e-5, atol=1e-5)

    print("KERNEL_OK")
</pallas_src>

<mosaic_0001>
module attributes {stable_mosaic.version = 11 : i64} {
  func.func @_bilinear_warp_kernel(%arg0: i32, %arg1: i32, %arg2: i32, %arg3: memref<1x4x256xf32, #tpu.memory_space<vmem>>, %arg4: memref<1x2x256xf32, #tpu.memory_space<vmem>>, %arg5: memref<1x4x256xf32, #tpu.memory_space<vmem>>, %arg6: memref<4x256xf32, #tpu.memory_space<vmem>>) attributes {dimension_semantics = [#tpu.dimension_semantics<parallel>, #tpu.dimension_semantics<parallel>, #tpu.dimension_semantics<arbitrary>], iteration_bounds = array<i64: 2, 1, 1>, scalar_prefetch = 0 : i64, scratch_operands = 1 : i64, tpu.core_type = #tpu.core_type<tc>, window_params = [{transform_indices = @transform_0, window_bounds = array<i64: 1, 4, 256>}, {transform_indices = @transform_1, window_bounds = array<i64: 1, 2, 256>}, {transform_indices = @transform_2, window_bounds = array<i64: 1, 4, 256>}]} {
    %c0_i32 = arith.constant 0 : i32
    %0 = arith.cmpi eq, %arg2, %c0_i32 : i32
    %1 = arith.extui %0 : i1 to i32
    %c0_i32_0 = arith.constant 0 : i32
    %2 = arith.cmpi ne, %1, %c0_i32_0 : i32
    scf.if %2 {
      %cst_29 = arith.constant 0.000000e+00 : f32
      %84 = vector.broadcast %cst_29 : f32 to vector<4x256xf32>
      %c0_30 = arith.constant 0 : index
      %c0_31 = arith.constant 0 : index
      %85 = vector.load %arg6[%c0_30, %c0_31] : memref<4x256xf32, #tpu.memory_space<vmem>>, vector<4x256xf32>
      tpu.vector_store %arg6[%c0_30, %c0_31], %84 {strides = array<i32>} : memref<4x256xf32, #tpu.memory_space<vmem>>, vector<4x256xf32>,
    } else {
    }
    %c0 = arith.constant 0 : index
    %c0_1 = arith.constant 0 : index
    %c0_2 = arith.constant 0 : index
    %3 = vector.load %arg4[%c0, %c0_1, %c0_2] : memref<1x2x256xf32, #tpu.memory_space<vmem>>, vector<1x2x256xf32>
    %4 = vector.shape_cast %3 : vector<1x2x256xf32> to vector<2x256xf32>
    %5 = vector.extract_strided_slice %4 {offsets = [0, 0], sizes = [1, 256], strides = [1, 1]} : vector<2x256xf32> to vector<1x256xf32>
    %6 = vector.extract_strided_slice %4 {offsets = [1, 0], sizes = [1, 256], strides = [1, 1]} : vector<2x256xf32> to vector<1x256xf32>
    %cst = arith.constant 1.000000e+00 : f32
    %7 = vector.broadcast %cst : f32 to vector<1x256xf32>
    %8 = arith.addf %6, %7 : vector<1x256xf32>
    %cst_3 = arith.constant 5.000000e-01 : f32
    %9 = vector.broadcast %cst_3 : f32 to vector<1x256xf32>
    %10 = arith.mulf %8, %9 : vector<1x256xf32>
    %cst_4 = arith.constant 1.500000e+01 : f32
    %11 = vector.broadcast %cst_4 : f32 to vector<1x256xf32>
    %12 = arith.mulf %10, %11 : vector<1x256xf32>
    %cst_5 = arith.constant 0.000000e+00 : f32
    %cst_6 = arith.constant 1.500000e+01 : f32
    %13 = vector.broadcast %cst_5 : f32 to vector<1x256xf32>
    %14 = arith.maximumf %13, %12 : vector<1x256xf32>
    %15 = vector.broadcast %cst_6 : f32 to vector<1x256xf32>
    %16 = arith.minimumf %15, %14 : vector<1x256xf32>
    %cst_7 = arith.constant 1.000000e+00 : f32
    %17 = vector.broadcast %cst_7 : f32 to vector<1x256xf32>
    %18 = arith.addf %5, %17 : vector<1x256xf32>
    %cst_8 = arith.constant 5.000000e-01 : f32
    %19 = vector.broadcast %cst_8 : f32 to vector<1x256xf32>
    %20 = arith.mulf %18, %19 : vector<1x256xf32>
    %cst_9 = arith.constant 1.500000e+01 : f32
    %21 = vector.broadcast %cst_9 : f32 to vector<1x256xf32>
    %22 = arith.mulf %20, %21 : vector<1x256xf32>
    %cst_10 = arith.constant 0.000000e+00 : f32
    %cst_11 = arith.constant 1.500000e+01 : f32
    %23 = vector.broadcast %cst_10 : f32 to vector<1x256xf32>
    %24 = arith.maximumf %23, %22 : vector<1x256xf32>
    %25 = vector.broadcast %cst_11 : f32 to vector<1x256xf32>
    %26 = arith.minimumf %25, %24 : vector<1x256xf32>
    %27 = math.floor %16 : vector<1x256xf32>
    %28 = math.floor %26 : vector<1x256xf32>
    %29 = arith.subf %16, %27 : vector<1x256xf32>
    %30 = arith.subf %26, %28 : vector<1x256xf32>
    %31 = arith.fptosi %27 : vector<1x256xf32> to vector<1x256xi32>
    %32 = arith.fptosi %28 : vector<1x256xf32> to vector<1x256xi32>
    %c16_i32 = arith.constant 16 : i32
    %33 = vector.broadcast %c16_i32 : i32 to vector<1x256xi32>
    %34 = arith.muli %32, %33 : vector<1x256xi32>
    %35 = arith.addi %34, %31 : vector<1x256xi32>
    %cst_12 = arith.constant 1.000000e+00 : f32
    %36 = vector.broadcast %cst_12 : f32 to vector<1x256xf32>
    %37 = arith.subf %36, %30 : vector<1x256xf32>
    %cst_13 = arith.constant 1.000000e+00 : f32
    %38 = vector.broadcast %cst_13 : f32 to vector<1x256xf32>
    %39 = arith.subf %38, %29 : vector<1x256xf32>
    %40 = arith.mulf %37, %39 : vector<1x256xf32>
    %cst_14 = arith.constant 1.000000e+00 : f32
    %41 = vector.broadcast %cst_14 : f32 to vector<1x256xf32>
    %42 = arith.subf %41, %30 : vector<1x256xf32>
    %43 = arith.mulf %42, %29 : vector<1x256xf32>
    %cst_15 = arith.constant 1.000000e+00 : f32
    %44 = vector.broadcast %cst_15 : f32 to vector<1x256xf32>
    %45 = arith.subf %44, %29 : vector<1x256xf32>
    %46 = arith.mulf %30, %45 : vector<1x256xf32>
    %47 = arith.mulf %30, %29 : vector<1x256xf32>
    %48 = tpu.iota {dimensions = array<i32: 0>} : vector<256x256xi32>
    %c256_i32 = arith.constant 256 : i32
    %49 = arith.muli %arg2, %c256_i32 : i32
    %50 = vector.broadcast %49 : i32 to vector<256x256xi32>
    %51 = arith.addi %48, %50 : vector<256x256xi32>
    %52 = vector.broadcast %35 : vector<1x256xi32> to vector<256x256xi32>
    %53 = arith.subi %51, %52 : vector<256x256xi32>
    %c0_i32_16 = arith.constant 0 : i32
    %54 = vector.broadcast %c0_i32_16 : i32 to vector<256x256xi32>
    %55 = arith.cmpi eq, %53, %54 : vector<256x256xi32>
    %c1_i32 = arith.constant 1 : i32
    %56 = vector.broadcast %c1_i32 : i32 to vector<256x256xi32>
    %57 = arith.cmpi eq, %53, %56 : vector<256x256xi32>
    %c16_i32_17 = arith.constant 16 : i32
    %58 = vector.broadcast %c16_i32_17 : i32 to vector<256x256xi32>
    %59 = arith.cmpi eq, %53, %58 : vector<256x256xi32>
    %c17_i32 = arith.constant 17 : i32
    %60 = vector.broadcast %c17_i32 : i32 to vector<256x256xi32>
    %61 = arith.cmpi eq, %53, %60 : vector<256x256xi32>
    %cst_18 = arith.constant 0.000000e+00 : f32
    %62 = vector.shape_cast %47 : vector<1x256xf32> to vector<1x256xf32>
    %63 = vector.broadcast %62 : vector<1x256xf32> to vector<256x256xf32>
    %64 = vector.broadcast %cst_18 : f32 to vector<256x256xf32>
    %65 = arith.select %61, %63, %64 : vector<256x256xi1>, vector<256x256xf32>
    %66 = vector.shape_cast %46 : vector<1x256xf32> to vector<1x256xf32>
    %67 = vector.broadcast %66 : vector<1x256xf32> to vector<256x256xf32>
    %68 = arith.select %59, %67, %65 : vector<256x256xi1>, vector<256x256xf32>
    %69 = vector.shape_cast %43 : vector<1x256xf32> to vector<1x256xf32>
    %70 = vector.broadcast %69 : vector<1x256xf32> to vector<256x256xf32>
    %71 = arith.select %57, %70, %68 : vector<256x256xi1>, vector<256x256xf32>
    %72 = vector.shape_cast %40 : vector<1x256xf32> to vector<1x256xf32>
    %73 = vector.broadcast %72 : vector<1x256xf32> to vector<256x256xf32>
    %74 = arith.select %55, %73, %71 : vector<256x256xi1>, vector<256x256xf32>
    %c0_19 = arith.constant 0 : index
    %c0_20 = arith.constant 0 : index
    %c0_21 = arith.constant 0 : index
    %75 = vector.load %arg3[%c0_19, %c0_20, %c0_21] : memref<1x4x256xf32, #tpu.memory_space<vmem>>, vector<1x4x256xf32>
    %76 = vector.shape_cast %75 : vector<1x4x256xf32> to vector<4x256xf32>
    %c0_22 = arith.constant 0 : index
    %c0_23 = arith.constant 0 : index
    %77 = vector.load %arg6[%c0_22, %c0_23] : memref<4x256xf32, #tpu.memory_space<vmem>>, vector<4x256xf32>
    %cst_24 = arith.constant dense<0.000000e+00> : vector<4x256xf32>
    %78 = tpu.matmul %76, %74, %cst_24 {dimension_numbers = #tpu.dot_dimension_numbers<[1], [0], [0], [1], [0, 0, 1, 1], [], []>} : vector<4x256xf32>, vector<256x256xf32>, vector<4x256xf32> -> vector<4x256xf32>
    %79 = arith.addf %77, %78 : vector<4x256xf32>
    %c0_25 = arith.constant 0 : index
    %c0_26 = arith.constant 0 : index
    %80 = vector.load %arg6[%c0_25, %c0_26] : memref<4x256xf32, #tpu.memory_space<vmem>>, vector<4x256xf32>
    tpu.vector_store %arg6[%c0_25, %c0_26], %79 {strides = array<i32>} : memref<4x256xf32, #tpu.memory_space<vmem>>, vector<4x256xf32>,
    %c0_i32_27 = arith.constant 0 : i32
    %81 = arith.cmpi eq, %arg2, %c0_i32_27 : i32
    %82 = arith.extui %81 : i1 to i32
    %c0_i32_28 = arith.constant 0 : i32
    %83 = arith.cmpi ne, %82, %c0_i32_28 : i32
    scf.if %83 {
      %c0_29 = arith.constant 0 : index
      %c0_30 = arith.constant 0 : index
      %84 = vector.load %arg6[%c0_29, %c0_30] : memref<4x256xf32, #tpu.memory_space<vmem>>, vector<4x256xf32>
      %c0_31 = arith.constant 0 : index
      %c0_32 = arith.constant 0 : index
      %c0_33 = arith.constant 0 : index
      %85 = vector.load %arg5[%c0_31, %c0_32, %c0_33] : memref<1x4x256xf32, #tpu.memory_space<vmem>>, vector<1x4x256xf32>
      %86 = vector.shape_cast %85 : vector<1x4x256xf32> to vector<4x256xf32>
      %87 = vector.shape_cast %84 : vector<4x256xf32> to vector<1x4x256xf32>
      tpu.vector_store %arg5[%c0_31, %c0_32, %c0_33], %87 {strides = array<i32>} : memref<1x4x256xf32, #tpu.memory_space<vmem>>, vector<1x4x256xf32>,
    } else {
    }
    return
  }
  func.func @transform_0(%arg0: i32, %arg1: i32, %arg2: i32) -> (i32, i32, i32) {
    %c0_i32 = arith.constant 0 : i32
    %c0_i32_0 = arith.constant 0 : i32
    return %arg0, %c0_i32, %arg2 : i32, i32, i32
  }
  func.func @transform_1(%arg0: i32, %arg1: i32, %arg2: i32) -> (i32, i32, i32) {
    %c0_i32 = arith.constant 0 : i32
    %c0_i32_0 = arith.constant 0 : i32
    return %arg0, %c0_i32, %arg1 : i32, i32, i32
  }
  func.func @transform_2(%arg0: i32, %arg1: i32, %arg2: i32) -> (i32, i32, i32) {
    %c0_i32 = arith.constant 0 : i32
    %c0_i32_0 = arith.constant 0 : i32
    return %arg0, %c0_i32, %arg1 : i32, i32, i32
  }
}

</mosaic_0001>

<bundles_post_ra>
// kernel: tpu_custom_call.1
= control target key start
LH: loop header
LB: loop body
LE: loop exit
PB: predicated region body
PF: predicated region fallthrough
CT: control target
= control target key end

     0   :  { %7 = vsyncpa [#allocation4], 0  ;;  %s2390_s0 = inlined_call_operand.hbm [shape: f32[2,4,256], index: 0, kind: input, shape index: {}]   ;;  %s2391_s1 = inlined_call_operand.hbm [shape: f32[2,2,256], index: 1, kind: input, shape index: {}]   ;;  %s2392_s2 = inlined_call_operand.hbm [shape: f32[2,4,256], index: 2, kind: output, shape index: {}]  }
   0x1   :  { %9 = vsyncpa [#allocation4 + $0x1], 0 }
   0x2   :  { %10 = vsyncpa [#allocation7], 0 }
   0x3   :  { %12 = vsyncpa [#allocation7 + $0x1], 0 }
   0x4   :  { %13 = vsyncpa [#allocation5], 0 }
   0x5   :  { %15 = vsyncpa [#allocation5 + $0x1], 0  ;;  %s1536_s9 = smov 0   ;;  %s1538_s10 = smov 0  }
   0x6   :  { %s1540_s11 = smov 0   ;;  %s1542_s12 = smov 0  }
   0x7   :  { %s1544_s13 = smov 0   ;;  %s1546_s14 = smov 0  }
   0x8 LB: > { %s1213_s15 = sadd.s32 4294967295, %s1516_s14   ;;  %s1214_s16 = sadd.s32 4294967294, %s1516_s14   ;;  %s1516_s14 = sphi %s1546_s14, %s21_s14   ;;  %s1512_s13 = sphi %s1544_s13, %s2412_s13   ;;  %s1508_s12 = sphi %s1542_s12, %s2411_s12   ;;  %s1504_s11 = sphi %s1540_s11, %s2410_s11   ;;  %s1500_s10 = sphi %s1538_s10, %s2409_s10   ;;  %s1496_s9 = sphi %s1536_s9, %s2408_s9  }
   0x9   : > { %s40_s17 = sadd.s32 1, %s1512_s13  ;;  %s49_s18 = sadd.s32 1, %s1504_s11 }
   0xa   : > { %p42_p0 = scmp.ge.s32.totalorder %s40_s17, 2  ;;  %p56_p1 = scmp.ne.s32.totalorder %s1504_s11, %s1500_s10 }
   0xb   : > { %p57_p2 = scmp.eq.s32.totalorder %s1516_s14, 0  ;;  %p62_p3 = scmp.ne.s32.totalorder %s1500_s10, %s1496_s9 }
   0xc   : > { %s2414_s17 = smov (%p42_p0, %s40_s17), 0  ;;  %p63_p5 = scmp.eq.s32.totalorder %s1213_s15, 0 }
   0xd   : > { %p1577_p4 = por %p57_p2, %p56_p1  ;;  %s44_s20 = ssub.s32 %s1512_s13, %s2414_s17 }
   0xe   : > { %p116_p6 = scmp.eq.s32.totalorder %s1213_s15, 1  ;;  %p47_p7 = scmp.eq.s32.totalorder %s44_s20, 0 }
   0xf   : > { %p1583_p8 = por %p63_p5, %p62_p3  ;;  %p122_p10 = scmp.eq.s32.totalorder %s1214_s16, 1 }
  0x10   : > { %p1587_p9 = por %p116_p6, %p56_p1  ;;  %p1319_p13 = scmp.lt.s32.totalorder %s1516_s14, 2 }
  0x11   : > { %s2396_s21 = scalar_select %p1583_p8, 1, 0 }
  0x12   : > { %s2397_s22 = scalar_select %p1587_p9, 1, 0 }
  0x13   : > { %s1592_s23 = scalar_select %p47_p7, %s1504_s11, %s49_s18  }
  0x14   : > { %p1594_p11 = por %p122_p10, %p62_p3  ;;  %s1601_s25 = sand.u32 1, %s1504_s11  }
  0x15   : > { %s1217_s26 = sshll.u32 %s1601_s25, 3  ;;  %s1233_s27 = sshll.u32 %s1512_s13, 7 }
  0x16   : > { %s2398_s24 = scalar_select %p1594_p11, 1, 0 }
  0x17   : > { %s1608_s30 = scalar_lea.hbm %s2390_s0, %s1233_s27  ;;  %s146_s3 = scalar_lea.vmem [#allocation3], %s1217_s26 }
  0x18   : > { %s156_s4 = sshll.u32 %s146_s3, 4  ;;  %p1614_p0 = pnand %p1319_p13, %p1577_p4  ;;  %s1610_s4 = int_to_ptr.vmem [resolvable:$true] %s156_s4 }
  0x19   : > { %s143_s6 = scalar_lea.sflag [#allocation4], %s1601_s25  ;;  %s1370_s7 = scalar_lea.hbm %s1608_s30, 128 }
  0x1a   : > { %p1371_p3 = scmp.ne.s32.totalorder %s1608_s30, %s1370_s7  ;;  %p1372_p5 = pneg %p1614_p0 }
  0x1b   : > { %s1375_s16 = scalar_lea.hbm %s2390_s0, 256  ;;  %p1376_p4 = scmp.lt.u32.totalorder %s1608_s30, %s2390_s0 }
  0x1c   : > { %p1373_p6 = pnand %p1372_p5, %p1371_p3  ;;  %p1377_p10 = scmp.lt.u32.totalorder %s1375_s16, %s1370_s7 }
  0x1d   : > { %p1379_p12 = scmp.lt.u32.totalorder %s1370_s7, %s1608_s30 }
  0x1e   : > { %p1374_p7 = pneg %p1373_p6  ;;  %p1378_p13 = por %p1377_p10, %p1376_p4 }
  0x20   : > { %p1380_p1 = por %p1379_p12, %p1378_p13 }
  0x22   : > { %p1381_p2 = pnand %p1380_p1, %p1374_p7 }
  0x24   : > { %1384 = shalt.err (!%p1381_p2)
}
  0x25   : > { %s1385_s20 = scalar_lea.vmem %s1610_s4, 128  ;;  %s1518_s26 = smov [#allocation3]  }
  0x26   : > { %p1386_p3 = scmp.ne.s32.totalorder %s1610_s4, %s1385_s20  ;;  %s1390_s27 = sshll.u32 %s1518_s26, 4  ;;  %s1391_s27 = int_to_ptr.vmem [resolvable:$false] %s1390_s27 }
  0x27   : > { %s1392_s28 = scalar_lea.vmem %s1391_s27, 256  ;;  %p1393_p9 = scmp.lt.s32.totalorder %s1610_s4, %s1391_s27 }
  0x28   : > { %p1388_p6 = pnand %p1386_p3, %p1372_p5  ;;  %p1394_p4 = scmp.lt.s32.totalorder %s1392_s28, %s1385_s20 }
  0x2a   : > { %p1389_p11 = pneg %p1388_p6  ;;  %p1395_p10 = por %p1394_p4, %p1393_p9 }
  0x2c   : > { %p1396_p12 = pnand %p1395_p10, %p1389_p11 }
  0x2e   : > { %1399 = shalt.err (!%p1396_p12)
}
  0x2f   : > { %1311 = dma.hbm_to_vmem [thread:$0]  (!%p1614_p0), %s1608_s30, 128, %s1610_s4, %s143_s6  }
  0x30   : > { %p2400_p1 = scmp.lt.s32.totalorder %s1516_s14, 3  ;;  %p2401_p2 = scmp.ge.s32.totalorder %s1516_s14, 1 }
  0x31   : > { %s1220_s3 = sshll.u32 %s1601_s25, 2  ;;  %s1234_s7 = sshll.u32 %s1512_s13, 6 }
  0x32   : > { %p1650_p7 = pnand %p2401_p2, %p2400_p1  ;;  %s1659_s16 = scalar_lea.hbm %s2391_s1, %s1234_s7 }
  0x33   : > { %s167_s18 = scalar_lea.vmem [#allocation6], %s1220_s3  ;;  %s164_s30 = scalar_lea.sflag [#allocation7], %s1601_s25 }
  0x34   : > { %s2402_s29 = scalar_select %p1650_p7, 1, 0 }
  0x35   : > { %s177_s19 = sshll.u32 %s167_s18, 4  ;;  %s1400_s4 = scalar_lea.hbm %s1659_s16, 64  ;;  %s178_s19 = int_to_ptr.vmem [resolvable:$true] %s177_s19 }
  0x36   : > { %p1401_p9 = scmp.ne.s32.totalorder %s1659_s16, %s1400_s4  ;;  %s1405_s26 = scalar_lea.hbm %s2391_s1, 128 }
  0x37   : > { %p1406_p3 = scmp.lt.u32.totalorder %s1659_s16, %s2391_s1  ;;  %p1407_p6 = scmp.lt.u32.totalorder %s1405_s26, %s1400_s4 }
  0x38   : > { %p1403_p11 = pnand %p1401_p9, %p1372_p5  ;;  %p1409_p10 = scmp.lt.u32.totalorder %s1400_s4, %s1659_s16 }
  0x39   : > { %p1408_p4 = por %p1407_p6, %p1406_p3 }
  0x3a   : > { %p1404_p13 = pneg %p1403_p11 }
  0x3b   : > { %p1410_p12 = por %p1409_p10, %p1408_p4 }
  0x3d   : > { %p1411_p1 = pnand %p1410_p12, %p1404_p13 }
  0x3f   : > { %1414 = shalt.err (!%p1411_p1)
}
  0x40   : > { %s1415_s25 = scalar_lea.vmem %s178_s19, 64  ;;  %s1519_s3 = smov [#allocation6]  }
  0x41   : > { %p1416_p2 = scmp.ne.s32.totalorder %s178_s19, %s1415_s25  ;;  %s1420_s7 = sshll.u32 %s1519_s3, 4  ;;  %s1421_s7 = int_to_ptr.vmem [resolvable:$false] %s1420_s7 }
  0x42   : > { %s1422_s8 = scalar_lea.vmem %s1421_s7, 128  ;;  %p1423_p8 = scmp.lt.s32.totalorder %s178_s19, %s1421_s7 }
  0x43   : > { %p1418_p9 = pnand %p1416_p2, %p1372_p5  ;;  %p1424_p7 = scmp.lt.s32.totalorder %s1422_s8, %s1415_s25 }
  0x45   : > { %p1419_p11 = pneg %p1418_p9  ;;  %p1425_p3 = por %p1424_p7, %p1423_p8 }
  0x47   : > { %p1426_p6 = pnand %p1425_p3, %p1419_p11 }
  0x49   : > { %1429 = shalt.err (!%p1426_p6)
}
  0x4a   : > { %1314 = dma.hbm_to_vmem [thread:$0]  (!%p1614_p0), %s1659_s16, 64, %s178_s19, %s164_s30  }
  0x4b   : > { %p2403_p13 = scmp.ne.s32.totalorder %s2402_s29, 0 }
  0x4c   : > { %s1684_s15 = sand.u32 (!%p2403_p13), 1, %s1500_s10   ;;  %p2404_p8 = scmp.ne.s32.totalorder (!%p2403_p13), %s2396_s21, 0 }
  0x4d   : > { %186 = sbr.rel (%p2403_p13) target bundleno = 503 (0x1f7), region = 28  ;;  %s1224_s18 = sshll.u32 (!%p2403_p13), %s1684_s15, 3 }
  0x4e   : > { %s189_s4 = scalar_lea.sflag (!%p2403_p13), [#allocation4], %s1684_s15  ;;  %s1690_s6 = scalar_lea.vmem (!%p2403_p13), [#allocation3], %s1224_s18 }
  0x54   : > { %1483 = dma.done.wait (%p2404_p8), %s189_s4, 128  }
  0x55   : > { %1485 = vsyncadd (%p2404_p8), %s189_s4, 4294967168  ;;  %s1225_s5 = sshll.u32 %s1684_s15, 2  ;;  %s198_s29 = scalar_lea.sflag [#allocation7], %s1684_s15 }
  0x56   : > { %s201_s16 = scalar_lea.vmem [#allocation6], %s1225_s5 }
  0x57   : > { %1487 = dma.done.wait (%p2404_p8), %s198_s29, 64  }
  0x58   : > { %1489 = vsyncadd (%p2404_p8), %s198_s29, 4294967232  ;;  %v235_v0 = vld [vmem:[%s201_s16] sm:$0xf]  ;;  %v261_v2 = vlaneseq  ;;  %s1235_s21 = sshll.u32 %s1508_s12, 7  ;;  %s226_s19 = scalar_lea.vmem [#allocation8], %s1224_s18 }
  0x59   : > { %v236_v1 = vadd.f32 1.0, %v235_v0  ;;  %s1100_s30 = sshll.u32 %s226_s19, 4  ;;  %s2341_s27 = scalar_lea.hbm %s2392_s2, %s1235_s21  ;;  %s2343_s30 = int_to_ptr.vmem [resolvable:$true] %s1100_s30 }
  0x5a   : > { %v1702_v5 = vshrl.u32 %v261_v2, 7  ;;  %s1084_s28 = scalar_lea.sflag [#allocation5], %s1684_s15  ;;  %s1430_s25 = scalar_lea.vmem %s2343_s30, 128 }
  0x5b   : > { %v237_v3 = vmul.f32 0.5, %v236_v1  ;;  %p1431_p0 = scmp.ne.s32.totalorder %s2343_s30, %s1430_s25  ;;  %p2405_p5 = scmp.ne.s32.totalorder %s2397_s22, 0 }
  0x5c   : > { %v1705_v8 = vsub.s32 0, %v1702_v5  ;;  %v1708_v9 = vsub.s32 2, %v1702_v5  ;;  %v1711_v10 = vadd.s32 8, %v1702_v5  ;;  %v1714_v12 = vadd.s32 16, %v1702_v5  ;;  %s1520_s12 = smov [#allocation8]  }
  0x5d   : > { %v238_v4 = vmul.f32 15.0, %v237_v3  ;;  %v1717_v13 = vadd.s32 24, %v1702_v5  ;;  %v1720_v14 = vadd.s32 32, %v1702_v5  ;;  %v1723_v15 = vadd.s32 40, %v1702_v5  ;;  %p1432_p7 = pnand %p1431_p0, %p2405_p5  ;;  %s1434_s3 = sshll.u32 %s1520_s12, 4  ;;  %s1435_s3 = int_to_ptr.vmem [resolvable:$false] %s1434_s3 }
  0x5e   : > { %v1726_v16 = vadd.s32 48, %v1702_v5  ;;  %v1729_v17 = vadd.s32 56, %v1702_v5  ;;  %v1732_v18 = vadd.s32 64, %v1702_v5  ;;  %v1735_v21 = vadd.s32 72, %v1702_v5  ;;  %s1436_s7 = scalar_lea.vmem %s1435_s3, 256  ;;  %p1437_p10 = scmp.lt.s32.totalorder %s2343_s30, %s1435_s3 }
  0x5f   : > { %v239_v6 = vmax.f32 %v238_v4, 0.0  ;;  %v1738_v22 = vadd.s32 80, %v1702_v5  ;;  %v1741_v23 = vadd.s32 88, %v1702_v5  ;;  %v1744_v24 = vadd.s32 96, %v1702_v5  ;;  %p1433_p4 = pneg %p1432_p7  ;;  %p1438_p12 = scmp.lt.s32.totalorder %s1436_s7, %s1430_s25 }
  0x60   : > { %v1747_v25 = vadd.s32 104, %v1702_v5  ;;  %v1750_v26 = vadd.s32 112, %v1702_v5  ;;  %v1753_v30 = vadd.s32 120, %v1702_v5  ;;  %v1756_v31 = vadd.s32 128, %v1702_v5 }
  0x61   : > { %v240_v7 = vmin.f32 %v239_v6, 15.0  ;;  %v1759_v32 = vadd.s32 136, %v1702_v5  ;;  %v1762_v33 = vadd.s32 144, %v1702_v5  ;;  %v1765_v34 = vadd.s32 152, %v1702_v5  ;;  %p1439_p1 = por %p1438_p12, %p1437_p10 }
  0x62   : > { %v1768_v39 = vadd.s32 160, %v1702_v5  ;;  %v1771_v40 = vadd.s32 168, %v1702_v5  ;;  %v1774_v41 = vadd.s32 176, %v1702_v5  ;;  %v1777_v42 = vadd.s32 184, %v1702_v5 }
  0x63   : > { %v241_v11 = vfloor.f32 %v240_v7  ;;  %v1780_v47 = vadd.s32 192, %v1702_v5  ;;  %v1783_v48 = vadd.s32 200, %v1702_v5  ;;  %v1786_v49 = vadd.s32 208, %v1702_v5  ;;  %p1440_p2 = pnand %p1439_p1, %p1433_p4 }
  0x64   : > { %v1789_v50 = vadd.s32 216, %v1702_v5 }
  0x65   : > { %v242_v19 = vsub.f32 %v240_v7, %v241_v11  ;;  %v1300_v20 = vtrunc.f32 %v241_v11 }
  0x67   : > { %v1301_v27 = vcvt.f32.s32 %v1300_v20  ;;  %v248_v28 = vsub.f32 1.0, %v242_v19  ;;  %v255_v29 = vrot.slane %v242_v19, 7 }
  0x69   : > { %v244_v35 = vmul.u32 16, %v1301_v27  ;;  %v1227_v36 = vrot.slane %v1301_v27, 9  ;;  %v250_v37 = vrot.slane %v248_v28, 7  ;;  %v256_v38 = vrot.slane %v255_v29, 2 }
  0x6b   : > { %v247_v43 = vadd.s32 %v1227_v36, %v244_v35  ;;  %v251_v44 = vrot.slane %v250_v37, 2  ;;  %v258_v45 = vmul.f32 %v256_v38, %v248_v28  ;;  %v260_v46 = vmul.f32 %v256_v38, %v242_v19 }
  0x6d   : > { %v253_v51 = vmul.f32 %v251_v44, %v248_v28  ;;  %v259_v52 = vmul.f32 %v251_v44, %v242_v19  ;;  %v331_v53 = vrot.slane %v247_v43, %v1705_v8  ;;  %v335_v54 = vrot.slane %v247_v43, %v1708_v9 }
  0x6e   : > { %v668_v55 = vrot.slane %v260_v46, %v1705_v8  ;;  %v672_v56 = vrot.slane %v260_v46, %v1708_v9  ;;  %v834_v57 = vrot.slane %v258_v45, %v1705_v8  ;;  %v838_v58 = vrot.slane %v258_v45, %v1708_v9 }
  0x6f   : > { %v1798_v59 = vrot.slane %v331_v53, %v1705_v8  ;;  %v1801_v60 = vrot.slane %v335_v54, %v1705_v8  ;;  %v751_v61 = vrot.slane %v259_v52, %v1705_v8  ;;  %v755_v62 = vrot.slane %v259_v52, %v1708_v9 }
  0x70   : > { %v1806_v63 = vrot.slane %v668_v55, %v1705_v8  ;;  %v1809_v0 = vrot.slane %v672_v56, %v1705_v8  ;;  %v1812_v1 = vrot.slane %v834_v57, %v1705_v8  ;;  %v1815_v2 = vrot.slane %v838_v58, %v1705_v8 }
  0x71   : > { %v1818_v3 = vrot.slane %v751_v61, %v1705_v8  ;;  %v1821_v4 = vrot.slane %v755_v62, %v1705_v8  ;;  %v917_v6 = vrot.slane %v253_v51, %v1705_v8  ;;  %v921_v7 = vrot.slane %v253_v51, %v1708_v9 }
  0x72   : > { %v345_v11 = vsub.s32 %v1702_v5, %v1801_v60  ;;  %v347_v19 = vsub.s32 %v1711_v10, %v1801_v60  ;;  %v344_v20 = vsub.s32 %v1702_v5, %v1798_v59  ;;  %v346_v27 = vsub.s32 %v1711_v10, %v1798_v59 }
  0x73   : > { %v1834_v28 = vrot.slane %v917_v6, %v1705_v8  ;;  %v1837_v29 = vrot.slane %v921_v7, %v1705_v8  ;;  %v349_v9 = vsub.s32 %v1714_v12, %v1801_v60  ;;  %v351_v35 = vsub.s32 %v1717_v13, %v1801_v60 }
  0x74   : > { %vm409_vm0 = vcmp.eq.s32.totalorder %v345_v11, 0  ;;  %vm411_vm1 = vcmp.eq.s32.totalorder %v347_v19, 0  ;;  %vm473_vm2 = vcmp.eq.s32.totalorder %v345_v11, 1  ;;  %vm475_vm3 = vcmp.eq.s32.totalorder %v347_v19, 1 }
  0x75   : > { %vm537_vm4 = vcmp.eq.s32.totalorder %v345_v11, 16  ;;  %vm539_vm5 = vcmp.eq.s32.totalorder %v347_v19, 16  ;;  %vm601_vm6 = vcmp.eq.s32.totalorder %v345_v11, 17  ;;  %vm603_vm7 = vcmp.eq.s32.totalorder %v347_v19, 17 }
  0x76   : > { %v684_v10 = vsel %vm601_vm6, %v1809_v0, 0.0  ;;  %v686_v36 = vsel %vm603_vm7, %v1809_v0, 0.0  ;;  %vm408_vm8 = vcmp.eq.s32.totalorder %v344_v20, 0  ;;  %vm410_vm9 = vcmp.eq.s32.totalorder %v346_v27, 0 }
  0x77   : > { %v767_v8 = vsel %vm537_vm4, %v1821_v4, %v684_v10  ;;  %v769_v37 = vsel %vm539_vm5, %v1821_v4, %v686_v36  ;;  %vm472_vm10 = vcmp.eq.s32.totalorder %v344_v20, 1  ;;  %vm474_vm11 = vcmp.eq.s32.totalorder %v346_v27, 1 }
  0x78   : > { %v850_v38 = vsel %vm473_vm2, %v1815_v2, %v767_v8  ;;  %v852_v43 = vsel %vm475_vm3, %v1815_v2, %v769_v37  ;;  %vm536_vm12 = vcmp.eq.s32.totalorder %v344_v20, 16  ;;  %vm538_vm13 = vcmp.eq.s32.totalorder %v346_v27, 16 }
  0x79   : > { %v933_v44 = vsel %vm409_vm0, %v1837_v29, %v850_v38  ;;  %v935_v45 = vsel %vm411_vm1, %v1837_v29, %v852_v43  ;;  %vm600_vm14 = vcmp.eq.s32.totalorder %v344_v20, 17  ;;  %vm602_vm15 = vcmp.eq.s32.totalorder %v346_v27, 17 }
  0x7a   : > { %v1236_v46 = vpack.c.bf16 %v935_v45, %v933_v44  ;;  %v683_v51 = vsel %vm600_vm14, %v1806_v63, 0.0  ;;  %v685_v52 = vsel %vm602_vm15, %v1806_v63, 0.0  ;;  %vm413_vm4 = vcmp.eq.s32.totalorder %v349_v9, 0 }
  0x7b   : > { %v766_v53 = vsel %vm536_vm12, %v1818_v3, %v683_v51  ;;  %v768_v54 = vsel %vm538_vm13, %v1818_v3, %v685_v52  ;;  %vm415_vm2 = vcmp.eq.s32.totalorder %v351_v35, 0  ;;  %vm477_vm3 = vcmp.eq.s32.totalorder %v349_v9, 1 }
  0x7c   : > { %1237 = vmatprep.subr.bf16.mxu0 %v1236_v46  ;;  %v849_v55 = vsel %vm472_vm10, %v1812_v1, %v766_v53  ;;  %v851_v56 = vsel %vm474_vm11, %v1812_v1, %v768_v54  ;;  %vm479_vm0 = vcmp.eq.s32.totalorder %v351_v35, 1  ;;  %vm541_vm1 = vcmp.eq.s32.totalorder %v349_v9, 16 }
  0x7d   : > { %v932_v57 = vsel %vm408_vm8, %v1834_v28, %v849_v55  ;;  %v934_v58 = vsel %vm410_vm9, %v1834_v28, %v851_v56  ;;  %vm543_vm5 = vcmp.eq.s32.totalorder %v351_v35, 16  ;;  %vm605_vm6 = vcmp.eq.s32.totalorder %v349_v9, 17 }
  0x7e   : > { %v1238_v61 = vpack.c.bf16 %v934_v58, %v932_v57  ;;  %vm607_vm7 = vcmp.eq.s32.totalorder %v351_v35, 17  ;;  %v688_v62 = vsel %vm605_vm6, %v1809_v0, 0.0  ;;  %v348_v6 = vsub.s32 %v1714_v12, %v1798_v59 }
  0x7f   : > { %v690_v7 = vsel %vm607_vm7, %v1809_v0, 0.0  ;;  %v771_v11 = vsel %vm541_vm1, %v1821_v4, %v688_v62  ;;  %v350_v19 = vsub.s32 %v1717_v13, %v1798_v59  ;;  %v353_v20 = vsub.s32 %v1720_v14, %v1801_v60 }
  0x80   : > { %1239 = vmatpush1.bf16.msra.mxu0 %v1238_v61  ;;  %v773_v27 = vsel %vm543_vm5, %v1821_v4, %v690_v7  ;;  %v854_v10 = vsel %vm477_vm3, %v1815_v2, %v771_v11  ;;  %vm412_vm8 = vcmp.eq.s32.totalorder %v348_v6, 0  ;;  %vm476_vm9 = vcmp.eq.s32.totalorder %v348_v6, 1 }
  0x81   : > { %v856_v12 = vsel %vm479_vm0, %v1815_v2, %v773_v27  ;;  %v937_v36 = vsel %vm413_vm4, %v1837_v29, %v854_v10  ;;  %vm414_vm10 = vcmp.eq.s32.totalorder %v350_v19, 0  ;;  %vm478_vm11 = vcmp.eq.s32.totalorder %v350_v19, 1 }
  0x82   : > { %v939_v13 = vsel %vm415_vm2, %v1837_v29, %v856_v12  ;;  %vm540_vm12 = vcmp.eq.s32.totalorder %v348_v6, 16  ;;  %vm542_vm13 = vcmp.eq.s32.totalorder %v350_v19, 16  ;;  %vm604_vm14 = vcmp.eq.s32.totalorder %v348_v6, 17 }
  0x83   : > { %v1240_v8 = vpack.c.bf16 %v939_v13, %v937_v36  ;;  %vm606_vm15 = vcmp.eq.s32.totalorder %v350_v19, 17  ;;  %v687_v37 = vsel %vm604_vm14, %v1806_v63, 0.0  ;;  %v355_v38 = vsub.s32 %v1723_v15, %v1801_v60 }
  0x84   : > { %v689_v43 = vsel %vm606_vm15, %v1806_v63, 0.0  ;;  %v770_v9 = vsel %vm540_vm12, %v1818_v3, %v687_v37  ;;  %vm417_vm4 = vcmp.eq.s32.totalorder %v353_v20, 0  ;;  %vm481_vm3 = vcmp.eq.s32.totalorder %v353_v20, 1 }
  0x85   : > { %1241 = vmatprep.subr.bf16.mxu0 %v1240_v8  ;;  %v772_v35 = vsel %vm542_vm13, %v1818_v3, %v689_v43  ;;  %v853_v44 = vsel %vm476_vm9, %v1812_v1, %v770_v9  ;;  %vm419_vm2 = vcmp.eq.s32.totalorder %v355_v38, 0  ;;  %vm483_vm0 = vcmp.eq.s32.totalorder %v355_v38, 1 }
  0x86   : > { %v855_v45 = vsel %vm478_vm11, %v1812_v1, %v772_v35  ;;  %v936_v46 = vsel %vm412_vm8, %v1834_v28, %v853_v44  ;;  %vm545_vm1 = vcmp.eq.s32.totalorder %v353_v20, 16  ;;  %vm547_vm5 = vcmp.eq.s32.totalorder %v355_v38, 16 }
  0x87   : > { %v938_v51 = vsel %vm414_vm10, %v1834_v28, %v855_v45  ;;  %vm609_vm6 = vcmp.eq.s32.totalorder %v353_v20, 17  ;;  %vm611_vm7 = vcmp.eq.s32.totalorder %v355_v38, 17  ;;  %v352_v52 = vsub.s32 %v1720_v14, %v1798_v59 }
  0x88   : > { %v1242_v53 = vpack.c.bf16 %v938_v51, %v936_v46  ;;  %v692_v54 = vsel %vm609_vm6, %v1809_v0, 0.0  ;;  %v694_v55 = vsel %vm611_vm7, %v1809_v0, 0.0  ;;  %v354_v56 = vsub.s32 %v1723_v15, %v1798_v59 }
  0x89   : > { %v775_v57 = vsel %vm545_vm1, %v1821_v4, %v692_v54  ;;  %v777_v58 = vsel %vm547_vm5, %v1821_v4, %v694_v55  ;;  %vm416_vm8 = vcmp.eq.s32.totalorder %v352_v52, 0  ;;  %vm480_vm9 = vcmp.eq.s32.totalorder %v352_v52, 1 }
  0x8a   : > { %1243 = vmatpush1.bf16.msra.mxu0 %v1242_v53  ;;  %v858_v61 = vsel %vm481_vm3, %v1815_v2, %v775_v57  ;;  %v860_v14 = vsel %vm483_vm0, %v1815_v2, %v777_v58  ;;  %vm418_vm10 = vcmp.eq.s32.totalorder %v354_v56, 0  ;;  %vm482_vm11 = vcmp.eq.s32.totalorder %v354_v56, 1 }
  0x8b   : > { %v941_v62 = vsel %vm417_vm4, %v1837_v29, %v858_v61  ;;  %v943_v15 = vsel %vm419_vm2, %v1837_v29, %v860_v14  ;;  %vm544_vm12 = vcmp.eq.s32.totalorder %v352_v52, 16  ;;  %vm546_vm13 = vcmp.eq.s32.totalorder %v354_v56, 16 }
  0x8c   : > { %v1244_v6 = vpack.c.bf16 %v943_v15, %v941_v62  ;;  %vm608_vm14 = vcmp.eq.s32.totalorder %v352_v52, 17  ;;  %vm610_vm15 = vcmp.eq.s32.totalorder %v354_v56, 17  ;;  %v357_v7 = vsub.s32 %v1726_v16, %v1801_v60 }
  0x8d   : > { %v691_v11 = vsel %vm608_vm14, %v1806_v63, 0.0  ;;  %v693_v19 = vsel %vm610_vm15, %v1806_v63, 0.0  ;;  %v359_v27 = vsub.s32 %v1729_v17, %v1801_v60  ;;  %v356_v20 = vsub.s32 %v1726_v16, %v1798_v59 }
  0x8e   : > { %1245 = vmatprep.subr.bf16.mxu0 %v1244_v6  ;;  %v774_v10 = vsel %vm544_vm12, %v1818_v3, %v691_v11  ;;  %v776_v12 = vsel %vm546_vm13, %v1818_v3, %v693_v19  ;;  %vm421_vm4 = vcmp.eq.s32.totalorder %v357_v7, 0  ;;  %vm485_vm3 = vcmp.eq.s32.totalorder %v357_v7, 1 }
  0x8f   : > { %v857_v36 = vsel %vm480_vm9, %v1812_v1, %v774_v10  ;;  %v859_v13 = vsel %vm482_vm11, %v1812_v1, %v776_v12  ;;  %vm423_vm2 = vcmp.eq.s32.totalorder %v359_v27, 0  ;;  %vm487_vm0 = vcmp.eq.s32.totalorder %v359_v27, 1 }
  0x90   : > { %v940_v8 = vsel %vm416_vm8, %v1834_v28, %v857_v36  ;;  %v942_v16 = vsel %vm418_vm10, %v1834_v28, %v859_v13  ;;  %vm549_vm1 = vcmp.eq.s32.totalorder %v357_v7, 16  ;;  %vm551_vm5 = vcmp.eq.s32.totalorder %v359_v27, 16 }
  0x91   : > { %v1246_v37 = vpack.c.bf16 %v942_v16, %v940_v8  ;;  %vm613_vm6 = vcmp.eq.s32.totalorder %v357_v7, 17  ;;  %vm615_vm7 = vcmp.eq.s32.totalorder %v359_v27, 17  ;;  %v358_v38 = vsub.s32 %v1729_v17, %v1798_v59 }
  0x92   : > { %v696_v43 = vsel %vm613_vm6, %v1809_v0, 0.0  ;;  %v698_v9 = vsel %vm615_vm7, %v1809_v0, 0.0  ;;  %vm420_vm9 = vcmp.eq.s32.totalorder %v356_v20, 0  ;;  %vm484_vm11 = vcmp.eq.s32.totalorder %v356_v20, 1 }
  0x93   : > { %1247 = vmatpush1.bf16.msra.mxu0 %v1246_v37  ;;  %v779_v35 = vsel %vm549_vm1, %v1821_v4, %v696_v43  ;;  %v781_v44 = vsel %vm551_vm5, %v1821_v4, %v698_v9  ;;  %vm422_vm8 = vcmp.eq.s32.totalorder %v358_v38, 0  ;;  %vm486_vm10 = vcmp.eq.s32.totalorder %v358_v38, 1 }
  0x94   : > { %v862_v45 = vsel %vm485_vm3, %v1815_v2, %v779_v35  ;;  %v864_v46 = vsel %vm487_vm0, %v1815_v2, %v781_v44  ;;  %vm548_vm12 = vcmp.eq.s32.totalorder %v356_v20, 16  ;;  %vm550_vm13 = vcmp.eq.s32.totalorder %v358_v38, 16 }
  0x95   : > { %v945_v17 = vsel %vm421_vm4, %v1837_v29, %v862_v45  ;;  %v947_v51 = vsel %vm423_vm2, %v1837_v29, %v864_v46  ;;  %vm612_vm14 = vcmp.eq.s32.totalorder %v356_v20, 17  ;;  %vm614_vm15 = vcmp.eq.s32.totalorder %v358_v38, 17 }
  0x96   : > { %v1248_v52 = vpack.c.bf16 %v947_v51, %v945_v17  ;;  %v695_v53 = vsel %vm612_vm14, %v1806_v63, 0.0  ;;  %v697_v54 = vsel %vm614_vm15, %v1806_v63, 0.0  ;;  %v361_v55 = vsub.s32 %v1732_v18, %v1801_v60 }
  0x97   : > { %v778_v56 = vsel %vm548_vm12, %v1818_v3, %v695_v53  ;;  %v780_v57 = vsel %vm550_vm13, %v1818_v3, %v697_v54  ;;  %v363_v58 = vsub.s32 %v1735_v21, %v1801_v60  ;;  %v360_v61 = vsub.s32 %v1732_v18, %v1798_v59 }
  0x98   : > { %1249 = vmatprep.subr.bf16.mxu0 %v1248_v52  ;;  %v861_v14 = vsel %vm484_vm11, %v1812_v1, %v778_v56  ;;  %v863_v62 = vsel %vm486_vm10, %v1812_v1, %v780_v57  ;;  %vm425_vm4 = vcmp.eq.s32.totalorder %v361_v55, 0  ;;  %vm489_vm3 = vcmp.eq.s32.totalorder %v361_v55, 1 }
  0x99   : > { %v944_v15 = vsel %vm420_vm9, %v1834_v28, %v861_v14  ;;  %v946_v6 = vsel %vm422_vm8, %v1834_v28, %v863_v62  ;;  %vm427_vm2 = vcmp.eq.s32.totalorder %v363_v58, 0  ;;  %vm491_vm0 = vcmp.eq.s32.totalorder %v363_v58, 1 }
  0x9a   : > { %v1250_v7 = vpack.c.bf16 %v946_v6, %v944_v15  ;;  %vm553_vm1 = vcmp.eq.s32.totalorder %v361_v55, 16  ;;  %vm555_vm5 = vcmp.eq.s32.totalorder %v363_v58, 16  ;;  %vm617_vm6 = vcmp.eq.s32.totalorder %v361_v55, 17 }
  0x9b   : > { %vm619_vm7 = vcmp.eq.s32.totalorder %v363_v58, 17  ;;  %v700_v18 = vsel %vm617_vm6, %v1809_v0, 0.0  ;;  %v362_v11 = vsub.s32 %v1735_v21, %v1798_v59  ;;  %vm424_vm11 = vcmp.eq.s32.totalorder %v360_v61, 0 }
  0x9c   : > { %1251 = vmatpush1.bf16.msra.mxu0 %v1250_v7  ;;  %v702_v19 = vsel %vm619_vm7, %v1809_v0, 0.0  ;;  %v783_v27 = vsel %vm553_vm1, %v1821_v4, %v700_v18  ;;  %vm488_vm9 = vcmp.eq.s32.totalorder %v360_v61, 1  ;;  %vm552_vm8 = vcmp.eq.s32.totalorder %v360_v61, 16 }
  0x9d   : > { %v785_v20 = vsel %vm555_vm5, %v1821_v4, %v702_v19  ;;  %v866_v10 = vsel %vm489_vm3, %v1815_v2, %v783_v27  ;;  %vm426_vm10 = vcmp.eq.s32.totalorder %v362_v11, 0  ;;  %vm490_vm12 = vcmp.eq.s32.totalorder %v362_v11, 1 }
  0x9e   : > { %v868_v12 = vsel %vm491_vm0, %v1815_v2, %v785_v20  ;;  %v949_v21 = vsel %vm425_vm4, %v1837_v29, %v866_v10  ;;  %vm554_vm13 = vcmp.eq.s32.totalorder %v362_v11, 16  ;;  %vm616_vm14 = vcmp.eq.s32.totalorder %v360_v61, 17 }
  0x9f   : > { %v951_v36 = vsel %vm427_vm2, %v1837_v29, %v868_v12  ;;  %vm618_vm15 = vcmp.eq.s32.totalorder %v362_v11, 17  ;;  %v699_v13 = vsel %vm616_vm14, %v1806_v63, 0.0  ;;  %v365_v8 = vsub.s32 %v1738_v22, %v1801_v60 }
  0xa0   : > { %v1252_v16 = vpack.c.bf16 %v951_v36, %v949_v21  ;;  %v701_v37 = vsel %vm618_vm15, %v1806_v63, 0.0  ;;  %v782_v38 = vsel %vm552_vm8, %v1818_v3, %v699_v13  ;;  %v367_v43 = vsub.s32 %v1741_v23, %v1801_v60 }
  0xa1   : > { %v784_v9 = vsel %vm554_vm13, %v1818_v3, %v701_v37  ;;  %v865_v35 = vsel %vm488_vm9, %v1812_v1, %v782_v38  ;;  %vm429_vm4 = vcmp.eq.s32.totalorder %v365_v8, 0  ;;  %vm493_vm3 = vcmp.eq.s32.totalorder %v365_v8, 1 }
  0xa2   : > { %1253 = vmatprep.subr.bf16.mxu0 %v1252_v16  ;;  %v867_v44 = vsel %vm490_vm12, %v1812_v1, %v784_v9  ;;  %v948_v45 = vsel %vm424_vm11, %v1834_v28, %v865_v35  ;;  %vm431_vm2 = vcmp.eq.s32.totalorder %v367_v43, 0  ;;  %vm495_vm0 = vcmp.eq.s32.totalorder %v367_v43, 1 }
  0xa3   : > { %v950_v46 = vsel %vm426_vm10, %v1834_v28, %v867_v44  ;;  %vm557_vm1 = vcmp.eq.s32.totalorder %v365_v8, 16  ;;  %vm559_vm5 = vcmp.eq.s32.totalorder %v367_v43, 16  ;;  %vm621_vm6 = vcmp.eq.s32.totalorder %v365_v8, 17 }
  0xa4   : > { %v1254_v17 = vpack.c.bf16 %v950_v46, %v948_v45  ;;  %vm623_vm7 = vcmp.eq.s32.totalorder %v367_v43, 17  ;;  %v704_v51 = vsel %vm621_vm6, %v1809_v0, 0.0  ;;  %v364_v52 = vsub.s32 %v1738_v22, %v1798_v59 }
  0xa5   : > { %v706_v53 = vsel %vm623_vm7, %v1809_v0, 0.0  ;;  %v787_v54 = vsel %vm557_vm1, %v1821_v4, %v704_v51  ;;  %v366_v55 = vsub.s32 %v1741_v23, %v1798_v59  ;;  %v369_v56 = vsub.s32 %v1744_v24, %v1801_v60 }
  0xa6   : > { %1255 = vmatpush1.bf16.msra.mxu0 %v1254_v17  ;;  %v789_v57 = vsel %vm559_vm5, %v1821_v4, %v706_v53  ;;  %v870_v58 = vsel %vm493_vm3, %v1815_v2, %v787_v54  ;;  %vm428_vm11 = vcmp.eq.s32.totalorder %v364_v52, 0  ;;  %vm492_vm9 = vcmp.eq.s32.totalorder %v364_v52, 1 }
  0xa7   : > { %v872_v22 = vsel %vm495_vm0, %v1815_v2, %v789_v57  ;;  %v953_v61 = vsel %vm429_vm4, %v1837_v29, %v870_v58  ;;  %vm430_vm8 = vcmp.eq.s32.totalorder %v366_v55, 0  ;;  %vm494_vm10 = vcmp.eq.s32.totalorder %v366_v55, 1 }
  0xa8   : > { %v955_v23 = vsel %vm431_vm2, %v1837_v29, %v872_v22  ;;  %vm556_vm12 = vcmp.eq.s32.totalorder %v364_v52, 16  ;;  %vm558_vm13 = vcmp.eq.s32.totalorder %v366_v55, 16  ;;  %vm620_vm14 = vcmp.eq.s32.totalorder %v364_v52, 17 }
  0xa9   : > { %v1256_v14 = vpack.c.bf16 %v955_v23, %v953_v61  ;;  %vm622_vm15 = vcmp.eq.s32.totalorder %v366_v55, 17  ;;  %v703_v62 = vsel %vm620_vm14, %v1806_v63, 0.0  ;;  %v371_v15 = vsub.s32 %v1747_v25, %v1801_v60 }
  0xaa   : > { %v705_v6 = vsel %vm622_vm15, %v1806_v63, 0.0  ;;  %v786_v7 = vsel %vm556_vm12, %v1818_v3, %v703_v62  ;;  %vm433_vm4 = vcmp.eq.s32.totalorder %v369_v56, 0  ;;  %vm497_vm3 = vcmp.eq.s32.totalorder %v369_v56, 1 }
  0xab   : > { %1257 = vmatprep.subr.bf16.mxu0 %v1256_v14  ;;  %v788_v18 = vsel %vm558_vm13, %v1818_v3, %v705_v6  ;;  %v869_v11 = vsel %vm492_vm9, %v1812_v1, %v786_v7  ;;  %vm435_vm2 = vcmp.eq.s32.totalorder %v371_v15, 0  ;;  %vm499_vm0 = vcmp.eq.s32.totalorder %v371_v15, 1 }
  0xac   : > { %v871_v19 = vsel %vm494_vm10, %v1812_v1, %v788_v18  ;;  %v952_v27 = vsel %vm428_vm11, %v1834_v28, %v869_v11  ;;  %vm561_vm1 = vcmp.eq.s32.totalorder %v369_v56, 16  ;;  %vm563_vm5 = vcmp.eq.s32.totalorder %v371_v15, 16 }
  0xad   : > { %v954_v20 = vsel %vm430_vm8, %v1834_v28, %v871_v19  ;;  %vm625_vm6 = vcmp.eq.s32.totalorder %v369_v56, 17  ;;  %vm627_vm7 = vcmp.eq.s32.totalorder %v371_v15, 17  ;;  %v368_v10 = vsub.s32 %v1744_v24, %v1798_v59 }
  0xae   : > { %v1258_v12 = vpack.c.bf16 %v954_v20, %v952_v27  ;;  %v708_v21 = vsel %vm625_vm6, %v1809_v0, 0.0  ;;  %v710_v36 = vsel %vm627_vm7, %v1809_v0, 0.0  ;;  %v370_v13 = vsub.s32 %v1747_v25, %v1798_v59 }
  0xaf   : > { %v791_v8 = vsel %vm561_vm1, %v1821_v4, %v708_v21  ;;  %v793_v16 = vsel %vm563_vm5, %v1821_v4, %v710_v36  ;;  %vm432_vm11 = vcmp.eq.s32.totalorder %v368_v10, 0  ;;  %vm496_vm9 = vcmp.eq.s32.totalorder %v368_v10, 1 }
  0xb0   : > { %1259 = vmatpush1.bf16.msra.mxu0 %v1258_v12  ;;  %v874_v37 = vsel %vm497_vm3, %v1815_v2, %v791_v8  ;;  %v876_v24 = vsel %vm499_vm0, %v1815_v2, %v793_v16  ;;  %vm434_vm8 = vcmp.eq.s32.totalorder %v370_v13, 0  ;;  %vm498_vm10 = vcmp.eq.s32.totalorder %v370_v13, 1 }
  0xb1   : > { %v957_v38 = vsel %vm433_vm4, %v1837_v29, %v874_v37  ;;  %v959_v25 = vsel %vm435_vm2, %v1837_v29, %v876_v24  ;;  %vm560_vm12 = vcmp.eq.s32.totalorder %v368_v10, 16  ;;  %vm562_vm13 = vcmp.eq.s32.totalorder %v370_v13, 16 }
  0xb2   : > { %v1260_v43 = vpack.c.bf16 %v959_v25, %v957_v38  ;;  %vm624_vm14 = vcmp.eq.s32.totalorder %v368_v10, 17  ;;  %vm626_vm15 = vcmp.eq.s32.totalorder %v370_v13, 17  ;;  %v373_v9 = vsub.s32 %v1750_v26, %v1801_v60 }
  0xb3   : > { %v707_v35 = vsel %vm624_vm14, %v1806_v63, 0.0  ;;  %v709_v44 = vsel %vm626_vm15, %v1806_v63, 0.0  ;;  %v375_v45 = vsub.s32 %v1753_v30, %v1801_v60  ;;  %v372_v46 = vsub.s32 %v1750_v26, %v1798_v59 }
  0xb4   : > { %1261 = vmatprep.subr.bf16.mxu0 %v1260_v43  ;;  %v790_v17 = vsel %vm560_vm12, %v1818_v3, %v707_v35  ;;  %v792_v51 = vsel %vm562_vm13, %v1818_v3, %v709_v44  ;;  %vm437_vm4 = vcmp.eq.s32.totalorder %v373_v9, 0  ;;  %vm501_vm3 = vcmp.eq.s32.totalorder %v373_v9, 1 }
  0xb5   : > { %v873_v52 = vsel %vm496_vm9, %v1812_v1, %v790_v17  ;;  %v875_v53 = vsel %vm498_vm10, %v1812_v1, %v792_v51  ;;  %vm439_vm2 = vcmp.eq.s32.totalorder %v375_v45, 0  ;;  %vm503_vm0 = vcmp.eq.s32.totalorder %v375_v45, 1 }
  0xb6   : > { %v956_v54 = vsel %vm432_vm11, %v1834_v28, %v873_v52  ;;  %v958_v26 = vsel %vm434_vm8, %v1834_v28, %v875_v53  ;;  %vm565_vm1 = vcmp.eq.s32.totalorder %v373_v9, 16  ;;  %vm567_vm5 = vcmp.eq.s32.totalorder %v375_v45, 16 }
  0xb7   : > { %v1262_v55 = vpack.c.bf16 %v958_v26, %v956_v54  ;;  %vm629_vm6 = vcmp.eq.s32.totalorder %v373_v9, 17  ;;  %vm631_vm7 = vcmp.eq.s32.totalorder %v375_v45, 17  ;;  %v374_v56 = vsub.s32 %v1753_v30, %v1798_v59 }
  0xb8   : > { %v712_v57 = vsel %vm629_vm6, %v1809_v0, 0.0  ;;  %v714_v58 = vsel %vm631_vm7, %v1809_v0, 0.0  ;;  %vm436_vm9 = vcmp.eq.s32.totalorder %v372_v46, 0  ;;  %vm500_vm10 = vcmp.eq.s32.totalorder %v372_v46, 1 }
  0xb9   : > { %1263 = vmatpush1.bf16.msra.mxu0 %v1262_v55  ;;  %v795_v22 = vsel %vm565_vm1, %v1821_v4, %v712_v57  ;;  %v797_v61 = vsel %vm567_vm5, %v1821_v4, %v714_v58  ;;  %vm438_vm11 = vcmp.eq.s32.totalorder %v374_v56, 0  ;;  %vm502_vm8 = vcmp.eq.s32.totalorder %v374_v56, 1 }
  0xba   : > { %v878_v23 = vsel %vm501_vm3, %v1815_v2, %v795_v22  ;;  %v880_v14 = vsel %vm503_vm0, %v1815_v2, %v797_v61  ;;  %vm564_vm12 = vcmp.eq.s32.totalorder %v372_v46, 16  ;;  %vm566_vm13 = vcmp.eq.s32.totalorder %v374_v56, 16 }
  0xbb   : > { %v961_v30 = vsel %vm437_vm4, %v1837_v29, %v878_v23  ;;  %v963_v62 = vsel %vm439_vm2, %v1837_v29, %v880_v14  ;;  %vm628_vm14 = vcmp.eq.s32.totalorder %v372_v46, 17  ;;  %vm630_vm15 = vcmp.eq.s32.totalorder %v374_v56, 17 }
  0xbc   : > { %v1264_v15 = vpack.c.bf16 %v963_v62, %v961_v30  ;;  %v711_v6 = vsel %vm628_vm14, %v1806_v63, 0.0  ;;  %v713_v7 = vsel %vm630_vm15, %v1806_v63, 0.0  ;;  %v377_v18 = vsub.s32 %v1756_v31, %v1801_v60 }
  0xbd   : > { %v794_v11 = vsel %vm564_vm12, %v1818_v3, %v711_v6  ;;  %v796_v19 = vsel %vm566_vm13, %v1818_v3, %v713_v7  ;;  %v379_v27 = vsub.s32 %v1759_v32, %v1801_v60  ;;  %v376_v20 = vsub.s32 %v1756_v31, %v1798_v59 }
  0xbe   : > { %1265 = vmatprep.subr.bf16.mxu0 %v1264_v15  ;;  %v877_v10 = vsel %vm500_vm10, %v1812_v1, %v794_v11  ;;  %v879_v12 = vsel %vm502_vm8, %v1812_v1, %v796_v19  ;;  %vm441_vm4 = vcmp.eq.s32.totalorder %v377_v18, 0  ;;  %vm505_vm3 = vcmp.eq.s32.totalorder %v377_v18, 1 }
  0xbf   : > { %v960_v21 = vsel %vm436_vm9, %v1834_v28, %v877_v10  ;;  %v962_v36 = vsel %vm438_vm11, %v1834_v28, %v879_v12  ;;  %vm443_vm2 = vcmp.eq.s32.totalorder %v379_v27, 0  ;;  %vm507_vm0 = vcmp.eq.s32.totalorder %v379_v27, 1 }
  0xc0   : > { %v1266_v13 = vpack.c.bf16 %v962_v36, %v960_v21  ;;  %vm569_vm1 = vcmp.eq.s32.totalorder %v377_v18, 16  ;;  %vm571_vm5 = vcmp.eq.s32.totalorder %v379_v27, 16  ;;  %vm633_vm6 = vcmp.eq.s32.totalorder %v377_v18, 17 }
  0xc1   : > { %vm635_vm7 = vcmp.eq.s32.totalorder %v379_v27, 17  ;;  %v716_v31 = vsel %vm633_vm6, %v1809_v0, 0.0  ;;  %v378_v8 = vsub.s32 %v1759_v32, %v1798_v59  ;;  %vm440_vm10 = vcmp.eq.s32.totalorder %v376_v20, 0 }
  0xc2   : > { %1267 = vmatpush1.bf16.msra.mxu0 %v1266_v13  ;;  %v718_v16 = vsel %vm635_vm7, %v1809_v0, 0.0  ;;  %v799_v37 = vsel %vm569_vm1, %v1821_v4, %v716_v31  ;;  %vm504_vm9 = vcmp.eq.s32.totalorder %v376_v20, 1  ;;  %vm568_vm11 = vcmp.eq.s32.totalorder %v376_v20, 16 }
  0xc3   : > { %v801_v24 = vsel %vm571_vm5, %v1821_v4, %v718_v16  ;;  %v882_v38 = vsel %vm505_vm3, %v1815_v2, %v799_v37  ;;  %vm442_vm8 = vcmp.eq.s32.totalorder %v378_v8, 0  ;;  %vm506_vm12 = vcmp.eq.s32.totalorder %v378_v8, 1 }
  0xc4   : > { %v884_v25 = vsel %vm507_vm0, %v1815_v2, %v801_v24  ;;  %v965_v32 = vsel %vm441_vm4, %v1837_v29, %v882_v38  ;;  %vm570_vm13 = vcmp.eq.s32.totalorder %v378_v8, 16  ;;  %vm632_vm14 = vcmp.eq.s32.totalorder %v376_v20, 17 }
  0xc5   : > { %v967_v43 = vsel %vm443_vm2, %v1837_v29, %v884_v25  ;;  %vm634_vm15 = vcmp.eq.s32.totalorder %v378_v8, 17  ;;  %v715_v9 = vsel %vm632_vm14, %v1806_v63, 0.0  ;;  %v381_v35 = vsub.s32 %v1762_v33, %v1801_v60 }
  0xc6   : > { %v1268_v44 = vpack.c.bf16 %v967_v43, %v965_v32  ;;  %v717_v45 = vsel %vm634_vm15, %v1806_v63, 0.0  ;;  %v798_v46 = vsel %vm568_vm11, %v1818_v3, %v715_v9  ;;  %v383_v17 = vsub.s32 %v1765_v34, %v1801_v60 }
  0xc7   : > { %v800_v51 = vsel %vm570_vm13, %v1818_v3, %v717_v45  ;;  %v881_v52 = vsel %vm504_vm9, %v1812_v1, %v798_v46  ;;  %vm445_vm4 = vcmp.eq.s32.totalorder %v381_v35, 0  ;;  %vm509_vm3 = vcmp.eq.s32.totalorder %v381_v35, 1 }
  0xc8   : > { %1269 = vmatprep.subr.bf16.mxu0 %v1268_v44  ;;  %v883_v53 = vsel %vm506_vm12, %v1812_v1, %v800_v51  ;;  %v964_v54 = vsel %vm440_vm10, %v1834_v28, %v881_v52  ;;  %vm447_vm2 = vcmp.eq.s32.totalorder %v383_v17, 0  ;;  %vm511_vm0 = vcmp.eq.s32.totalorder %v383_v17, 1 }
  0xc9   : > { %v966_v26 = vsel %vm442_vm8, %v1834_v28, %v883_v53  ;;  %vm573_vm1 = vcmp.eq.s32.totalorder %v381_v35, 16  ;;  %vm575_vm5 = vcmp.eq.s32.totalorder %v383_v17, 16  ;;  %vm637_vm6 = vcmp.eq.s32.totalorder %v381_v35, 17 }
  0xca   : > { %v1270_v55 = vpack.c.bf16 %v966_v26, %v964_v54  ;;  %vm639_vm7 = vcmp.eq.s32.totalorder %v383_v17, 17  ;;  %v720_v56 = vsel %vm637_vm6, %v1809_v0, 0.0  ;;  %v380_v57 = vsub.s32 %v1762_v33, %v1798_v59 }
  0xcb   : > { %v722_v58 = vsel %vm639_vm7, %v1809_v0, 0.0  ;;  %v803_v22 = vsel %vm573_vm1, %v1821_v4, %v720_v56  ;;  %v382_v61 = vsub.s32 %v1765_v34, %v1798_v59  ;;  %v385_v23 = vsub.s32 %v1768_v39, %v1801_v60 }
  0xcc   : > { %1271 = vmatpush1.bf16.msra.mxu0 %v1270_v55  ;;  %v805_v14 = vsel %vm575_vm5, %v1821_v4, %v722_v58  ;;  %v886_v30 = vsel %vm509_vm3, %v1815_v2, %v803_v22  ;;  %vm444_vm10 = vcmp.eq.s32.totalorder %v380_v57, 0  ;;  %vm508_vm9 = vcmp.eq.s32.totalorder %v380_v57, 1 }
  0xcd   : > { %v888_v33 = vsel %vm511_vm0, %v1815_v2, %v805_v14  ;;  %v969_v62 = vsel %vm445_vm4, %v1837_v29, %v886_v30  ;;  %vm446_vm11 = vcmp.eq.s32.totalorder %v382_v61, 0  ;;  %vm510_vm8 = vcmp.eq.s32.totalorder %v382_v61, 1 }
  0xce   : > { %v971_v34 = vsel %vm447_vm2, %v1837_v29, %v888_v33  ;;  %vm572_vm12 = vcmp.eq.s32.totalorder %v380_v57, 16  ;;  %vm574_vm13 = vcmp.eq.s32.totalorder %v382_v61, 16  ;;  %vm636_vm14 = vcmp.eq.s32.totalorder %v380_v57, 17 }
  0xcf   : > { %v1272_v15 = vpack.c.bf16 %v971_v34, %v969_v62  ;;  %vm638_vm15 = vcmp.eq.s32.totalorder %v382_v61, 17  ;;  %v719_v6 = vsel %vm636_vm14, %v1806_v63, 0.0  ;;  %v387_v7 = vsub.s32 %v1771_v40, %v1801_v60 }
  0xd0   : > { %v721_v18 = vsel %vm638_vm15, %v1806_v63, 0.0  ;;  %v802_v11 = vsel %vm572_vm12, %v1818_v3, %v719_v6  ;;  %vm449_vm4 = vcmp.eq.s32.totalorder %v385_v23, 0  ;;  %vm513_vm3 = vcmp.eq.s32.totalorder %v385_v23, 1 }
  0xd1   : > { %1273 = vmatprep.subr.bf16.mxu0 %v1272_v15  ;;  %v804_v19 = vsel %vm574_vm13, %v1818_v3, %v721_v18  ;;  %v885_v27 = vsel %vm508_vm9, %v1812_v1, %v802_v11  ;;  %vm451_vm2 = vcmp.eq.s32.totalorder %v387_v7, 0  ;;  %vm515_vm0 = vcmp.eq.s32.totalorder %v387_v7, 1 }
  0xd2   : > { %v887_v20 = vsel %vm510_vm8, %v1812_v1, %v804_v19  ;;  %v968_v10 = vsel %vm444_vm10, %v1834_v28, %v885_v27  ;;  %vm577_vm1 = vcmp.eq.s32.totalorder %v385_v23, 16  ;;  %vm579_vm5 = vcmp.eq.s32.totalorder %v387_v7, 16 }
  0xd3   : > { %v970_v12 = vsel %vm446_vm11, %v1834_v28, %v887_v20  ;;  %vm641_vm6 = vcmp.eq.s32.totalorder %v385_v23, 17  ;;  %vm643_vm7 = vcmp.eq.s32.totalorder %v387_v7, 17  ;;  %v384_v21 = vsub.s32 %v1768_v39, %v1798_v59 }
  0xd4   : > { %v1274_v36 = vpack.c.bf16 %v970_v12, %v968_v10  ;;  %v724_v13 = vsel %vm641_vm6, %v1809_v0, 0.0  ;;  %v726_v31 = vsel %vm643_vm7, %v1809_v0, 0.0  ;;  %v386_v8 = vsub.s32 %v1771_v40, %v1798_v59 }
  0xd5   : > { %v807_v16 = vsel %vm577_vm1, %v1821_v4, %v724_v13  ;;  %v809_v37 = vsel %vm579_vm5, %v1821_v4, %v726_v31  ;;  %vm448_vm10 = vcmp.eq.s32.totalorder %v384_v21, 0  ;;  %vm512_vm9 = vcmp.eq.s32.totalorder %v384_v21, 1 }
  0xd6   : > { %1275 = vmatpush1.bf16.msra.mxu0 %v1274_v36  ;;  %v890_v24 = vsel %vm513_vm3, %v1815_v2, %v807_v16  ;;  %v892_v39 = vsel %vm515_vm0, %v1815_v2, %v809_v37  ;;  %vm450_vm11 = vcmp.eq.s32.totalorder %v386_v8, 0  ;;  %vm514_vm8 = vcmp.eq.s32.totalorder %v386_v8, 1 }
  0xd7   : > { %v973_v38 = vsel %vm449_vm4, %v1837_v29, %v890_v24  ;;  %v975_v40 = vsel %vm451_vm2, %v1837_v29, %v892_v39  ;;  %vm576_vm12 = vcmp.eq.s32.totalorder %v384_v21, 16  ;;  %vm578_vm13 = vcmp.eq.s32.totalorder %v386_v8, 16 }
  0xd8   : > { %v1276_v25 = vpack.c.bf16 %v975_v40, %v973_v38  ;;  %vm640_vm14 = vcmp.eq.s32.totalorder %v384_v21, 17  ;;  %vm642_vm15 = vcmp.eq.s32.totalorder %v386_v8, 17  ;;  %v389_v32 = vsub.s32 %v1774_v41, %v1801_v60 }
  0xd9   : > { %v723_v43 = vsel %vm640_vm14, %v1806_v63, 0.0  ;;  %v725_v9 = vsel %vm642_vm15, %v1806_v63, 0.0  ;;  %v391_v35 = vsub.s32 %v1777_v42, %v1801_v60  ;;  %v388_v44 = vsub.s32 %v1774_v41, %v1798_v59 }
  0xda   : > { %1277 = vmatprep.subr.bf16.mxu0 %v1276_v25  ;;  %v806_v45 = vsel %vm576_vm12, %v1818_v3, %v723_v43  ;;  %v808_v46 = vsel %vm578_vm13, %v1818_v3, %v725_v9  ;;  %vm453_vm4 = vcmp.eq.s32.totalorder %v389_v32, 0  ;;  %vm517_vm3 = vcmp.eq.s32.totalorder %v389_v32, 1 }
  0xdb   : > { %v889_v17 = vsel %vm512_vm9, %v1812_v1, %v806_v45  ;;  %v891_v51 = vsel %vm514_vm8, %v1812_v1, %v808_v46  ;;  %vm455_vm2 = vcmp.eq.s32.totalorder %v391_v35, 0  ;;  %vm519_vm0 = vcmp.eq.s32.totalorder %v391_v35, 1 }
  0xdc   : > { %v972_v52 = vsel %vm448_vm10, %v1834_v28, %v889_v17  ;;  %v974_v41 = vsel %vm450_vm11, %v1834_v28, %v891_v51  ;;  %vm581_vm1 = vcmp.eq.s32.totalorder %v389_v32, 16  ;;  %vm583_vm5 = vcmp.eq.s32.totalorder %v391_v35, 16 }
  0xdd   : > { %v1278_v53 = vpack.c.bf16 %v974_v41, %v972_v52  ;;  %vm645_vm6 = vcmp.eq.s32.totalorder %v389_v32, 17  ;;  %vm647_vm7 = vcmp.eq.s32.totalorder %v391_v35, 17  ;;  %v390_v54 = vsub.s32 %v1777_v42, %v1798_v59 }
  0xde   : > { %v728_v26 = vsel %vm645_vm6, %v1809_v0, 0.0  ;;  %v730_v55 = vsel %vm647_vm7, %v1809_v0, 0.0  ;;  %vm452_vm9 = vcmp.eq.s32.totalorder %v388_v44, 0  ;;  %vm516_vm8 = vcmp.eq.s32.totalorder %v388_v44, 1 }
  0xdf   : > { %1279 = vmatpush1.bf16.msra.mxu0 %v1278_v53  ;;  %v811_v56 = vsel %vm581_vm1, %v1821_v4, %v728_v26  ;;  %v813_v57 = vsel %vm583_vm5, %v1821_v4, %v730_v55  ;;  %vm454_vm10 = vcmp.eq.s32.totalorder %v390_v54, 0  ;;  %vm518_vm11 = vcmp.eq.s32.totalorder %v390_v54, 1 }
  0xe0   : > { %v894_v58 = vsel %vm517_vm3, %v1815_v2, %v811_v56  ;;  %v896_v22 = vsel %vm519_vm0, %v1815_v2, %v813_v57  ;;  %vm580_vm12 = vcmp.eq.s32.totalorder %v388_v44, 16  ;;  %vm582_vm13 = vcmp.eq.s32.totalorder %v390_v54, 16 }
  0xe1   : > { %v977_v42 = vsel %vm453_vm4, %v1837_v29, %v894_v58  ;;  %v979_v61 = vsel %vm455_vm2, %v1837_v29, %v896_v22  ;;  %vm644_vm14 = vcmp.eq.s32.totalorder %v388_v44, 17  ;;  %vm646_vm15 = vcmp.eq.s32.totalorder %v390_v54, 17 }
  0xe2   : > { %v1280_v23 = vpack.c.bf16 %v979_v61, %v977_v42  ;;  %v727_v14 = vsel %vm644_vm14, %v1806_v63, 0.0  ;;  %v729_v30 = vsel %vm646_vm15, %v1806_v63, 0.0  ;;  %v393_v33 = vsub.s32 %v1780_v47, %v1801_v60 }
  0xe3   : > { %v810_v62 = vsel %vm580_vm12, %v1818_v3, %v727_v14  ;;  %v812_v34 = vsel %vm582_vm13, %v1818_v3, %v729_v30  ;;  %v395_v15 = vsub.s32 %v1783_v48, %v1801_v60  ;;  %v392_v6 = vsub.s32 %v1780_v47, %v1798_v59 }
  0xe4   : > { %1281 = vmatprep.subr.bf16.mxu0 %v1280_v23  ;;  %v893_v7 = vsel %vm516_vm8, %v1812_v1, %v810_v62  ;;  %v895_v18 = vsel %vm518_vm11, %v1812_v1, %v812_v34  ;;  %vm457_vm4 = vcmp.eq.s32.totalorder %v393_v33, 0  ;;  %vm521_vm3 = vcmp.eq.s32.totalorder %v393_v33, 1 }
  0xe5   : > { %v976_v11 = vsel %vm452_vm9, %v1834_v28, %v893_v7  ;;  %v978_v19 = vsel %vm454_vm10, %v1834_v28, %v895_v18  ;;  %vm459_vm2 = vcmp.eq.s32.totalorder %v395_v15, 0  ;;  %vm523_vm0 = vcmp.eq.s32.totalorder %v395_v15, 1 }
  0xe6   : > { %v1282_v27 = vpack.c.bf16 %v978_v19, %v976_v11  ;;  %vm585_vm1 = vcmp.eq.s32.totalorder %v393_v33, 16  ;;  %vm587_vm5 = vcmp.eq.s32.totalorder %v395_v15, 16  ;;  %vm649_vm6 = vcmp.eq.s32.totalorder %v393_v33, 17 }
  0xe7   : > { %vm651_vm7 = vcmp.eq.s32.totalorder %v395_v15, 17  ;;  %v732_v47 = vsel %vm649_vm6, %v1809_v0, 0.0  ;;  %v394_v20 = vsub.s32 %v1783_v48, %v1798_v59  ;;  %vm456_vm8 = vcmp.eq.s32.totalorder %v392_v6, 0 }
  0xe8   : > { %1283 = vmatpush1.bf16.msra.mxu0 %v1282_v27  ;;  %v734_v10 = vsel %vm651_vm7, %v1809_v0, 0.0  ;;  %v815_v12 = vsel %vm585_vm1, %v1821_v4, %v732_v47  ;;  %vm520_vm9 = vcmp.eq.s32.totalorder %v392_v6, 1  ;;  %vm584_vm10 = vcmp.eq.s32.totalorder %v392_v6, 16  ;;  %v996_v47 = vld [vmem:[%s1690_s6] sm:$0xff] }
  0xe9   : > { %v817_v21 = vsel %vm587_vm5, %v1821_v4, %v734_v10  ;;  %v898_v36 = vsel %vm521_vm3, %v1815_v2, %v815_v12  ;;  %vm458_vm11 = vcmp.eq.s32.totalorder %v394_v20, 0  ;;  %vm522_vm12 = vcmp.eq.s32.totalorder %v394_v20, 1 }
  0xea   : > { %v900_v13 = vsel %vm523_vm0, %v1815_v2, %v817_v21  ;;  %v981_v48 = vsel %vm457_vm4, %v1837_v29, %v898_v36  ;;  %vm586_vm13 = vcmp.eq.s32.totalorder %v394_v20, 16  ;;  %vm648_vm14 = vcmp.eq.s32.totalorder %v392_v6, 17 }
  0xeb   : > { %v983_v31 = vsel %vm459_vm2, %v1837_v29, %v900_v13  ;;  %vm650_vm15 = vcmp.eq.s32.totalorder %v394_v20, 17  ;;  %v731_v8 = vsel %vm648_vm14, %v1806_v63, 0.0  ;;  %v397_v16 = vsub.s32 %v1786_v49, %v1801_v60 }
  0xec   : > { %v1284_v37 = vpack.c.bf16 %v983_v31, %v981_v48  ;;  %v733_v24 = vsel %vm650_vm15, %v1806_v63, 0.0  ;;  %v814_v39 = vsel %vm584_vm10, %v1818_v3, %v731_v8  ;;  %v399_v38 = vsub.s32 %v1789_v50, %v1801_v60 }
  0xed   : > { %v816_v40 = vsel %vm586_vm13, %v1818_v3, %v733_v24  ;;  %v897_v25 = vsel %vm520_vm9, %v1812_v1, %v814_v39  ;;  %vm461_vm4 = vcmp.eq.s32.totalorder %v397_v16, 0  ;;  %vm525_vm3 = vcmp.eq.s32.totalorder %v397_v16, 1 }
  0xee   : > { %1285 = vmatprep.subr.bf16.mxu0 %v1284_v37  ;;  %v899_v32 = vsel %vm522_vm12, %v1812_v1, %v816_v40  ;;  %v980_v43 = vsel %vm456_vm8, %v1834_v28, %v897_v25  ;;  %vm463_vm2 = vcmp.eq.s32.totalorder %v399_v38, 0  ;;  %vm527_vm0 = vcmp.eq.s32.totalorder %v399_v38, 1 }
  0xef   : > { %v982_v9 = vsel %vm458_vm11, %v1834_v28, %v899_v32  ;;  %vm589_vm1 = vcmp.eq.s32.totalorder %v397_v16, 16  ;;  %vm591_vm5 = vcmp.eq.s32.totalorder %v399_v38, 16  ;;  %vm653_vm6 = vcmp.eq.s32.totalorder %v397_v16, 17 }
  0xf0   : > { %v1286_v35 = vpack.c.bf16 %v982_v9, %v980_v43  ;;  %vm655_vm7 = vcmp.eq.s32.totalorder %v399_v38, 17  ;;  %v736_v44 = vsel %vm653_vm6, %v1809_v0, 0.0  ;;  %v396_v45 = vsub.s32 %v1786_v49, %v1798_v59 }
  0xf1   : > { %v738_v46 = vsel %vm655_vm7, %v1809_v0, 0.0  ;;  %v819_v17 = vsel %vm589_vm1, %v1821_v4, %v736_v44  ;;  %v398_v51 = vsub.s32 %v1789_v50, %v1798_v59  ;;  %v290_v52 = vadd.s32 224, %v1702_v5 }
  0xf2   : > { %1287 = vmatpush1.bf16.msra.mxu0 %v1286_v35  ;;  %v821_v41 = vsel %vm591_vm5, %v1821_v4, %v738_v46  ;;  %v902_v53 = vsel %vm525_vm3, %v1815_v2, %v819_v17  ;;  %vm460_vm8 = vcmp.eq.s32.totalorder %v396_v45, 0  ;;  %vm524_vm9 = vcmp.eq.s32.totalorder %v396_v45, 1 }
  0xf3   : > { %v904_v49 = vsel %vm527_vm0, %v1815_v2, %v821_v41  ;;  %v985_v54 = vsel %vm461_vm4, %v1837_v29, %v902_v53  ;;  %vm462_vm10 = vcmp.eq.s32.totalorder %v398_v51, 0  ;;  %vm526_vm11 = vcmp.eq.s32.totalorder %v398_v51, 1 }
  0xf4   : > { %v987_v50 = vsel %vm463_vm2, %v1837_v29, %v904_v49  ;;  %vm588_vm12 = vcmp.eq.s32.totalorder %v396_v45, 16  ;;  %vm590_vm13 = vcmp.eq.s32.totalorder %v398_v51, 16  ;;  %vm652_vm14 = vcmp.eq.s32.totalorder %v396_v45, 17 }
  0xf5   : > { %v1288_v26 = vpack.c.bf16 %v987_v50, %v985_v54  ;;  %vm654_vm15 = vcmp.eq.s32.totalorder %v398_v51, 17  ;;  %v735_v55 = vsel %vm652_vm14, %v1806_v63, 0.0  ;;  %v291_v56 = vadd.s32 232, %v1702_v5 }
  0xf6   : > { %v737_v57 = vsel %vm654_vm15, %v1806_v63, 0.0  ;;  %v818_v58 = vsel %vm588_vm12, %v1818_v3, %v735_v55  ;;  %v401_v22 = vsub.s32 %v290_v52, %v1801_v60  ;;  %v400_v42 = vsub.s32 %v290_v52, %v1798_v59 }
  0xf7   : > { %1289 = vmatprep.subr.bf16.mxu0 %v1288_v26  ;;  %v820_v61 = vsel %vm590_vm13, %v1818_v3, %v737_v57  ;;  %v901_v23 = vsel %vm524_vm9, %v1812_v1, %v818_v58  ;;  %v403_v14 = vsub.s32 %v291_v56, %v1801_v60  ;;  %v402_v30 = vsub.s32 %v291_v56, %v1798_v59 }
  0xf8   : > { %v903_v33 = vsel %vm526_vm11, %v1812_v1, %v820_v61  ;;  %v984_v62 = vsel %vm460_vm8, %v1834_v28, %v901_v23  ;;  %vm465_vm4 = vcmp.eq.s32.totalorder %v401_v22, 0  ;;  %vm529_vm3 = vcmp.eq.s32.totalorder %v401_v22, 1 }
  0xf9   : > { %v986_v34 = vsel %vm462_vm10, %v1834_v28, %v903_v33  ;;  %vm467_vm2 = vcmp.eq.s32.totalorder %v403_v14, 0  ;;  %vm531_vm0 = vcmp.eq.s32.totalorder %v403_v14, 1  ;;  %vm593_vm1 = vcmp.eq.s32.totalorder %v401_v22, 16 }
  0xfa   : > { %v1290_v15 = vpack.c.bf16 %v986_v34, %v984_v62  ;;  %vm595_vm5 = vcmp.eq.s32.totalorder %v403_v14, 16  ;;  %vm657_vm6 = vcmp.eq.s32.totalorder %v401_v22, 17  ;;  %vm659_vm7 = vcmp.eq.s32.totalorder %v403_v14, 17 }
  0xfb   : > { %v740_v6 = vsel %vm657_vm6, %v1809_v0, 0.0  ;;  %v742_v7 = vsel %vm659_vm7, %v1809_v0, 0.0  ;;  %vm464_vm9 = vcmp.eq.s32.totalorder %v400_v42, 0  ;;  %vm466_vm11 = vcmp.eq.s32.totalorder %v402_v30, 0 }
  0xfc   : > { %1291 = vmatpush1.bf16.msra.mxu0 %v1290_v15  ;;  %v823_v18 = vsel %vm593_vm1, %v1821_v4, %v740_v6  ;;  %v825_v11 = vsel %vm595_vm5, %v1821_v4, %v742_v7  ;;  %vm528_vm8 = vcmp.eq.s32.totalorder %v400_v42, 1  ;;  %vm530_vm10 = vcmp.eq.s32.totalorder %v402_v30, 1 }
  0xfd   : > { %v906_v19 = vsel %vm529_vm3, %v1815_v2, %v823_v18  ;;  %v908_v27 = vsel %vm531_vm0, %v1815_v2, %v825_v11  ;;  %vm592_vm12 = vcmp.eq.s32.totalorder %v400_v42, 16  ;;  %vm594_vm13 = vcmp.eq.s32.totalorder %v402_v30, 16 }
  0xfe   : > { %v989_v20 = vsel %vm465_vm4, %v1837_v29, %v906_v19  ;;  %v991_v10 = vsel %vm467_vm2, %v1837_v29, %v908_v27  ;;  %vm656_vm14 = vcmp.eq.s32.totalorder %v400_v42, 17  ;;  %vm658_vm15 = vcmp.eq.s32.totalorder %v402_v30, 17 }
  0xff   : > { %v1292_v12 = vpack.c.bf16 %v991_v10, %v989_v20  ;;  %v739_v21 = vsel %vm656_vm14, %v1806_v63, 0.0  ;;  %v741_v36 = vsel %vm658_vm15, %v1806_v63, 0.0  ;;  %v292_v13 = vadd.s32 240, %v1702_v5 }
 0x100   : > { %v822_v48 = vsel %vm592_vm12, %v1818_v3, %v739_v21  ;;  %v824_v31 = vsel %vm594_vm13, %v1818_v3, %v741_v36  ;;  %v293_v8 = vadd.s32 248, %v1702_v5  ;;  %v999_v16 = vcombine.high %v996_v47, %v996_v47 }
 0x101   : > { %1293 = vmatprep.subr.bf16.mxu0 %v1292_v12  ;;  %v905_v37 = vsel %vm528_vm8, %v1812_v1, %v822_v48  ;;  %v907_v24 = vsel %vm530_vm10, %v1812_v1, %v824_v31  ;;  %v405_v39 = vsub.s32 %v292_v13, %v1801_v60  ;;  %v404_v5 = vsub.s32 %v292_v13, %v1798_v59 }
 0x102   : > { %v988_v38 = vsel %vm464_vm9, %v1834_v28, %v905_v37  ;;  %v990_v40 = vsel %vm466_vm11, %v1834_v28, %v907_v24  ;;  %v407_v25 = vsub.s32 %v293_v8, %v1801_v60  ;;  %1065 = vmatprep.mubr.f32.mxu0 %v999_v16  ;;  %v406_v43 = vsub.s32 %v293_v8, %v1798_v59 }
 0x103   : > { %v1294_v32 = vpack.c.bf16 %v990_v40, %v988_v38  ;;  %vm469_vm4 = vcmp.eq.s32.totalorder %v405_v39, 0  ;;  %vm597_vm3 = vcmp.eq.s32.totalorder %v405_v39, 16  ;;  %vm533_vm0 = vcmp.eq.s32.totalorder %v405_v39, 1 }
 0x104   : > { %vm471_vm2 = vcmp.eq.s32.totalorder %v407_v25, 0  ;;  %vm599_vm1 = vcmp.eq.s32.totalorder %v407_v25, 16  ;;  %vm661_vm5 = vcmp.eq.s32.totalorder %v405_v39, 17  ;;  %vm535_vm6 = vcmp.eq.s32.totalorder %v407_v25, 1 }
 0x105   : > { %1295 = vmatpush1.bf16.msra.mxu0 %v1294_v32  ;;  %vm663_vm7 = vcmp.eq.s32.totalorder %v407_v25, 17  ;;  %v744_v9 = vsel %vm661_vm5, %v1809_v0, 0.0  ;;  %vm468_vm9 = vcmp.eq.s32.totalorder %v404_v5, 0  ;;  %vm532_vm11 = vcmp.eq.s32.totalorder %v404_v5, 1 }
 0x106   : > { %v746_v60 = vsel %vm663_vm7, %v1809_v0, 0.0  ;;  %v827_v35 = vsel %vm597_vm3, %v1821_v4, %v744_v9  ;;  %vm534_vm8 = vcmp.eq.s32.totalorder %v406_v43, 1  ;;  %vm596_vm10 = vcmp.eq.s32.totalorder %v404_v5, 16 }
 0x107   : > { %v829_v44 = vsel %vm599_vm1, %v1821_v4, %v746_v60  ;;  %v910_v59 = vsel %vm533_vm0, %v1815_v2, %v827_v35  ;;  %vm598_vm12 = vcmp.eq.s32.totalorder %v406_v43, 16  ;;  %vm660_vm13 = vcmp.eq.s32.totalorder %v404_v5, 17 }
 0x108   : > { %v912_v45 = vsel %vm535_vm6, %v1815_v2, %v829_v44  ;;  %v993_v46 = vsel %vm469_vm4, %v1837_v29, %v910_v59  ;;  %vm662_vm14 = vcmp.eq.s32.totalorder %v406_v43, 17  ;;  %vm470_vm15 = vcmp.eq.s32.totalorder %v406_v43, 0 }
 0x109   : > { %v995_v0 = vsel %vm471_vm2, %v1837_v29, %v912_v45  ;;  %v743_v17 = vsel %vm660_vm13, %v1806_v63, 0.0  ;;  %v745_v4 = vsel %vm662_vm14, %v1806_v63, 0.0 }
 0x10a   : > { %v1296_v51 = vpack.c.bf16 %v995_v0, %v993_v46  ;;  %v826_v52 = vsel %vm596_vm10, %v1818_v3, %v743_v17  ;;  %v828_v2 = vsel %vm598_vm12, %v1818_v3, %v745_v4 }
 0x10b   : > { %v909_v41 = vsel %vm532_vm11, %v1812_v1, %v826_v52  ;;  %v911_v53 = vsel %vm534_vm8, %v1812_v1, %v828_v2 }
 0x10c   : > { %1297 = vmatprep.subr.bf16.mxu0 %v1296_v51  ;;  %v992_v29 = vsel %vm468_vm9, %v1834_v28, %v909_v41  ;;  %v994_v49 = vsel %vm470_vm15, %v1834_v28, %v911_v53 }
 0x10d   : > { %v1298_v63 = vpack.c.bf16 %v994_v49, %v992_v29 }
 0x10f   : > { %1299 = vmatpush1.bf16.msra.mxu0 %v1298_v63 }
 0x112   : > { %1066 = vmatmul.mubr.f32.vlgmr.msra.gmra.mrb[0].mxu0 %v996_v47 }
 0x1e5   : > { %v1067_v3 = vpop.f32.mrb[0].mxu0 }
 0x1e6   : > { %v1069_v54 = vpop.f32.mrb[1].mxu0 }
 0x1e7   : > { %v1074_v50 = vcombine.low %v1067_v3, %v1069_v54 }
 0x1e9   : > { %1082 = vst [vmem:[%s226_s19] sm:$0xff] %v1074_v50 }
 0x1ea   : > { %1443 = shalt.err (!%p1440_p2)
}
 0x1eb   : > { %s1444_s8 = scalar_lea.hbm %s2341_s27, 128  ;;  %s1448_s4 = scalar_lea.hbm %s2392_s2, 256 }
 0x1ec   : > { %p1445_p9 = scmp.ne.s32.totalorder %s2341_s27, %s1444_s8  ;;  %p1449_p6 = scmp.lt.u32.totalorder %s2341_s27, %s2392_s2 }
 0x1ed   : > { %p1450_p13 = scmp.lt.u32.totalorder %s1448_s4, %s1444_s8  ;;  %p1452_p0 = scmp.lt.u32.totalorder %s1444_s8, %s2341_s27 }
 0x1ee   : > { %p1446_p11 = pnand %p1445_p9, %p2405_p5 }
 0x1ef   : > { %p1451_p8 = por %p1450_p13, %p1449_p6 }
 0x1f0   : > { %p1447_p3 = pneg %p1446_p11 }
 0x1f1   : > { %p1453_p7 = por %p1452_p0, %p1451_p8 }
 0x1f3   : > { %p1454_p4 = pnand %p1453_p7, %p1447_p3 }
 0x1f5   : > { %1457 = shalt.err (!%p1454_p4)
}
 0x1f6   : > { %1306 = dma.vmem_to_hbm [thread:$0]  (%p2405_p5), %s2343_s30, 128, %s2341_s27, %s1084_s28  }
 0x1f7 PF: > { %s1112_s29 = sand.u32 1, %s1496_s9   ;;  %p2406_p10 = scmp.ne.s32.totalorder %s2398_s24, 0 }
 0x1f8   : > { %p2407_p12 = scmp.ge.s32.totalorder %s1516_s14, 2  ;;  %s1113_s16 = scalar_lea.sflag [#allocation5], %s1112_s29 }
 0x1fa   : > { %p1316_p1 = pnand %p2407_p12, %p2406_p10 }
 0x1fc   : > { %1491 = dma.done.wait (!%p1316_p1), %s1113_s16, 128  }
 0x1fd   : > { %1493 = vsyncadd (!%p1316_p1), %s1113_s16, 4294967168  ;;  %s21_s14 = sadd.s32 1, %s1516_s14   ;;  %s2408_s9 = smov %s1500_s10 }
 0x1fe   : > { %p18_p2 = scmp.ge.s32.totalorder %s21_s14, 4   ;;  %s2409_s10 = smov %s1504_s11 }
 0x1ff   : > { %s2410_s11 = smov %s1592_s23  ;;  %s2411_s12 = smov %s1512_s13 }
 0x200   : > { %s2412_s13 = smov %s2414_s17  ;;  %20 = sbr.rel (!%p18_p2) target bundleno = 8 (0x8), region = 94 }
 0x207   :  { %1118 = vsyncpa [#allocation4], 1 }
 0x208   :  { %1120 = vsyncpa [#allocation4 + $0x1], 1 }
 0x209   :  { %1121 = vsyncpa [#allocation7], 1 }
 0x20a   :  { %1123 = vsyncpa [#allocation7 + $0x1], 1 }
 0x20b   :  { %1124 = vsyncpa [#allocation5], 1 }
 0x20c   :  { %1126 = vsyncpa [#allocation5 + $0x1], 1 }

</bundles_post_ra>
